<compile_context>
chip_gen: v5e
topology: v5e:2x2
jax: 0.10.0
libtpu: 0.0.40
codegen_flags: <defaults>
</compile_context>

<pallas_src>
import functools

import numpy as np

import jax
import jax.numpy as jnp
from jax.experimental import pallas as pl
from jax.experimental.pallas import tpu as pltpu

LANE = 128
SUBLANE = 8
NEG_INF = -1e30


def _round_up(x, m):
    return (x + m - 1) // m * m


def _vmem_limit_bytes():
    """Per-generation VMEM ask: ~80% of physical, leaving compiler headroom."""
    try:
        cap = int(pltpu.get_tpu_info().vmem_capacity_bytes)
        return max(32 << 20, min(int(cap * 0.8), cap - (8 << 20)))
    except Exception:
        return 64 << 20


# ----------------------------- in-kernel helpers ------------------------------

def _layernorm_padded(x, w, b, c_true, eps=1e-5):
    """LayerNorm over the first `c_true` lanes of a zero-padded (..., CP) tile.

    Two-pass (x - mu)^2 variance; pad lanes (which are kept exactly zero in the
    activations) are masked out of the variance sum, and since w/b are zero in
    the pad lanes the output pad lanes stay exactly zero.  Matches
    torch.nn.LayerNorm (biased variance, eps=1e-5).
    """
    lane = jax.lax.broadcasted_iota(jnp.int32, x.shape, x.ndim - 1)
    real = lane < c_true
    inv_c = 1.0 / c_true
    mu = jnp.sum(x, axis=-1, keepdims=True) * inv_c          # pad lanes are zero
    d = jnp.where(real, x - mu, 0.0)
    var = jnp.sum(d * d, axis=-1, keepdims=True) * inv_c
    return d * jax.lax.rsqrt(var + eps) * w + b


def _gelu_exact(x):
    # torch.nn.GELU default = exact erf formulation.
    return 0.5 * x * (1.0 + jax.lax.erf(x * (2.0 ** -0.5)))


# ---------------------------------- kernel ------------------------------------

def vit_fused_kernel(patches_ref, tok_bias_ref, pw_ref,
                     ln1w_ref, ln1b_ref, qkvw_ref, qkvb_ref,
                     projw_ref, projb_ref, ln2w_ref, ln2b_ref,
                     fc1w_ref, fc1b_ref, fc2w_ref, fc2b_ref,
                     normw_ref, normb_ref, headw_ref, headb_ref,
                     out_ref, x_state,
                     *, num_heads, head_dim, n_true, n_pad, batch_tile,
                     c_true, c_pad):
    d = pl.program_id(1)                  # depth (layer) index, innermost grid axis
    f32 = jnp.float32
    cdt = jnp.bfloat16                    # matmul operand dtype (f32 accumulation)
    m_rows = batch_tile * n_pad

    # ---- iteration 0: fused patch embedding + cls token + positional embed ----
    @pl.when(d == 0)
    def _init():
        p = patches_ref[0]                                     # (M, KP) bf16
        emb = jnp.dot(p, pw_ref[...], preferred_element_type=f32)
        # tok_bias already contains pos_embed + (cls token | conv bias) per row;
        # padded token rows are zero.
        x_state[...] = emb + tok_bias_ref[...]

    x = x_state[...]                                           # (M, CP) f32, resident

    # --------------------------------- attention -------------------------------
    h = _layernorm_padded(x, ln1w_ref[0], ln1b_ref[0], c_true)
    qkv = (jnp.dot(h.astype(cdt), qkvw_ref[0], preferred_element_type=f32)
           + qkvb_ref[0])                                      # (M, 3*CP)
    qkv3 = qkv.reshape(batch_tile, n_pad, 3 * c_pad)           # per-image view

    # in-kernel key-padding mask (no (M,M) bias DMA'd from HBM)
    if n_pad > n_true:
        col = jax.lax.broadcasted_iota(jnp.int32, (batch_tile, n_pad, n_pad), 2)
        key_ok = col < n_true
    else:
        key_ok = None

    head_outs = []
    for hh in range(num_heads):
        o0 = hh * head_dim
        # dense head slices (no 128 padding); q already carries 1/sqrt(head_dim).
        q = qkv3[:, :, o0:o0 + head_dim].astype(cdt)
        k = qkv3[:, :, c_pad + o0:c_pad + o0 + head_dim].astype(cdt)
        v = qkv3[:, :, 2 * c_pad + o0:2 * c_pad + o0 + head_dim].astype(cdt)
        s = jnp.einsum('bqd,bkd->bqk', q, k,
                       preferred_element_type=f32)             # (BT, N_pad, N_pad)
        if key_ok is not None:
            s = jnp.where(key_ok, s, NEG_INF)
        s = s - jnp.max(s, axis=-1, keepdims=True)
        probs = jnp.exp(s)
        probs = probs * pl.reciprocal(jnp.sum(probs, axis=-1, keepdims=True),
                                      approx=True)
        head_outs.append(jnp.einsum('bqk,bkd->bqd', probs.astype(cdt), v,
                                    preferred_element_type=f32))
    if c_pad > c_true:
        head_outs.append(jnp.zeros((batch_tile, n_pad, c_pad - c_true), f32))
    o_cat = jnp.concatenate(head_outs, axis=-1).reshape(m_rows, c_pad)
    # single output-projection matmul over the full embed dim
    attn = jnp.dot(o_cat.astype(cdt), projw_ref[0], preferred_element_type=f32)
    x = x + attn + projb_ref[0]

    # ------------------------------------ MLP ----------------------------------
    h2 = _layernorm_padded(x, ln2w_ref[0], ln2b_ref[0], c_true)
    f = jnp.dot(h2.astype(cdt), fc1w_ref[0], preferred_element_type=f32) + fc1b_ref[0]
    f = _gelu_exact(f)
    f = jnp.dot(f.astype(cdt), fc2w_ref[0], preferred_element_type=f32) + fc2b_ref[0]
    x = x + f
    x_state[...] = x

    # ---- last iteration: final LayerNorm on cls tokens + classifier head ------
    @pl.when(d == pl.num_programs(1) - 1)
    def _head():
        if batch_tile == 1:
            cls = x[0:1, :]                                    # contiguous slice
        else:
            # cls tokens sit at rows 0, n_pad, 2*n_pad, ... -> one strided read
            cls = x_state[pl.ds(0, batch_tile, n_pad), :]
        cls = _layernorm_padded(cls, normw_ref[...], normb_ref[...], c_true)
        out_ref[0] = (jnp.dot(cls.astype(cdt), headw_ref[...],
                              preferred_element_type=f32) + headb_ref[...])


# --------------------------------- wrappers ------------------------------------

def pack_vit_params(pr, cfg):
    """Convert torch-layout parameters into padded/stacked kernel parameters."""
    C = cfg["embed_dim"]
    H = cfg["num_heads"]
    hd = C // H
    Cin = cfg["in_channels"]
    PS = cfg["patch_size"]
    NC = cfg["num_classes"]
    HM = cfg["mlp_hidden"]
    N = cfg["num_patches"] + 1
    N_pad = _round_up(N, SUBLANE)
    BT = cfg["batch_tile"]

    K = Cin * PS * PS
    CP = _round_up(C, LANE)
    KP = _round_up(K, LANE)
    HMP = _round_up(HM, LANE)
    NCP = _round_up(NC, LANE)
    scale = hd ** (-0.5)

    f32 = np.float32
    bf16 = jnp.bfloat16

    def padded(a, shape):
        out = np.zeros(shape, f32)
        a = np.asarray(a, f32)
        out[tuple(slice(0, s) for s in a.shape)] = a
        return out

    # patch projection: conv weight (C, Cin, PS, PS) -> (K, C) -> zero-pad (KP, CP)
    patch_w = padded(np.asarray(pr["conv_w"], f32).reshape(C, K).T, (KP, CP))

    # per-row token bias: pos_embed + (cls token on row 0, conv bias elsewhere),
    # padded to N_pad rows per image (pad rows zero), replicated per batch tile.
    pos = padded(pr["pos"], (N, CP))
    cls_row = padded(np.asarray(pr["cls"], f32)[None, :], (1, CP))
    convb_row = padded(np.asarray(pr["conv_b"], f32)[None, :], (1, CP))
    tok = pos + np.concatenate([cls_row, np.tile(convb_row, (N - 1, 1))], axis=0)
    tok = np.concatenate([tok, np.zeros((N_pad - N, CP), f32)], axis=0)   # (N_pad, CP)
    tok_bias = np.tile(tok, (BT, 1))                                      # (M, CP)

    def stack(fn):
        return np.stack([fn(blk) for blk in pr["blocks"]], axis=0)

    def pack_qkv_w(blk):
        w = np.asarray(blk["qkv_w"], f32)                     # torch (3C, C)
        out = np.zeros((CP, 3 * CP), f32)
        for t in range(3):                                    # q, k, v sections
            wt = w[t * C:(t + 1) * C, :].T                    # (C, C): in x out
            if t == 0:
                wt = wt * scale                               # fold 1/sqrt(hd) into q
            out[:C, t * CP:t * CP + C] = wt
        return out

    def pack_qkv_b(blk):
        b = np.asarray(blk["qkv_b"], f32)
        out = np.zeros((1, 3 * CP), f32)
        for t in range(3):
            bt_ = b[t * C:(t + 1) * C]
            if t == 0:
                bt_ = bt_ * scale
            out[0, t * CP:t * CP + C] = bt_
        return out

    def pack_proj_w(blk):
        return padded(np.asarray(blk["proj_w"], f32).T, (CP, CP))

    return {
        "patch_w": jnp.asarray(patch_w, bf16),
        "tok_bias": jnp.asarray(tok_bias),
        "ln1_w": jnp.asarray(stack(lambda b: padded(np.asarray(b["ln1_w"])[None, :], (1, CP)))),
        "ln1_b": jnp.asarray(stack(lambda b: padded(np.asarray(b["ln1_b"])[None, :], (1, CP)))),
        "qkv_w": jnp.asarray(stack(pack_qkv_w), bf16),
        "qkv_b": jnp.asarray(stack(pack_qkv_b)),
        "proj_w": jnp.asarray(stack(pack_proj_w), bf16),
        "proj_b": jnp.asarray(stack(lambda b: padded(np.asarray(b["proj_b"])[None, :], (1, CP)))),
        "ln2_w": jnp.asarray(stack(lambda b: padded(np.asarray(b["ln2_w"])[None, :], (1, CP)))),
        "ln2_b": jnp.asarray(stack(lambda b: padded(np.asarray(b["ln2_b"])[None, :], (1, CP)))),
        "fc1_w": jnp.asarray(stack(lambda b: padded(np.asarray(b["fc1_w"], f32).T, (CP, HMP))), bf16),
        "fc1_b": jnp.asarray(stack(lambda b: padded(np.asarray(b["fc1_b"])[None, :], (1, HMP)))),
        "fc2_w": jnp.asarray(stack(lambda b: padded(np.asarray(b["fc2_w"], f32).T, (HMP, CP))), bf16),
        "fc2_b": jnp.asarray(stack(lambda b: padded(np.asarray(b["fc2_b"])[None, :], (1, CP)))),
        "norm_w": jnp.asarray(padded(np.asarray(pr["norm_w"])[None, :], (1, CP))),
        "norm_b": jnp.asarray(padded(np.asarray(pr["norm_b"])[None, :], (1, CP))),
        "head_w": jnp.asarray(padded(np.asarray(pr["head_w"], f32).T, (CP, NCP)), bf16),
        "head_b": jnp.asarray(padded(np.asarray(pr["head_b"])[None, :], (1, NCP))),
    }


def vit_forward_pallas(x_nchw, kp, cfg):
    B, Cin, IMG, _ = x_nchw.shape
    PS = cfg["patch_size"]
    GH = IMG // PS
    P = GH * GH
    N = P + 1
    C = cfg["embed_dim"]
    H = cfg["num_heads"]
    hd = C // H
    depth = cfg["depth"]
    NC = cfg["num_classes"]

    BT = cfg["batch_tile"]
    assert B % BT == 0
    BTILES = B // BT
    N_pad = _round_up(N, SUBLANE)
    M = BT * N_pad

    K = Cin * PS * PS
    CP = _round_up(C, LANE)
    KP = _round_up(K, LANE)
    HMP = _round_up(cfg["mlp_hidden"], LANE)
    NCP = _round_up(NC, LANE)

    # glue: non-overlapping patch extraction (== stride=PS conv as a matmul),
    # zero-pad the feature dim to 128 lanes, add an all-zero "patch" row for the
    # cls token and N_pad-N zero pad rows per image, cast to bf16 (half the DMA).
    patches = x_nchw.reshape(B, Cin, GH, PS, GH, PS)
    patches = patches.transpose(0, 2, 4, 1, 3, 5).reshape(B, P, K)
    patches = jnp.pad(patches, ((0, 0), (0, 0), (0, KP - K)))
    patches = jnp.concatenate(
        [jnp.zeros((B, 1, KP), patches.dtype), patches,
         jnp.zeros((B, N_pad - N, KP), patches.dtype)], axis=1)
    patches = patches.reshape(BTILES, M, KP).astype(jnp.bfloat16)

    def _const(shape):
        nd = len(shape)
        return pl.BlockSpec(shape, lambda bt, d, _nd=nd: (0,) * _nd)

    def _per_layer(shape):
        nd = len(shape)
        return pl.BlockSpec((1,) + shape, lambda bt, d, _nd=nd: (d,) + (0,) * _nd)

    in_specs = [
        pl.BlockSpec((1, M, KP), lambda bt, d: (bt, 0, 0)),       # patches
        _const((M, CP)),                                          # tok_bias
        _const((KP, CP)),                                         # patch proj W
        _per_layer((1, CP)), _per_layer((1, CP)),                 # ln1 w, b
        _per_layer((CP, 3 * CP)), _per_layer((1, 3 * CP)),        # qkv w, b (dense)
        _per_layer((CP, CP)), _per_layer((1, CP)),                # proj w, b
        _per_layer((1, CP)), _per_layer((1, CP)),                 # ln2 w, b
        _per_layer((CP, HMP)), _per_layer((1, HMP)),              # fc1 w, b
        _per_layer((HMP, CP)), _per_layer((1, CP)),               # fc2 w, b
        _const((1, CP)), _const((1, CP)),                         # final norm w, b
        _const((CP, NCP)), _const((1, NCP)),                      # head w, b
    ]
    out_spec = pl.BlockSpec((1, BT, NCP), lambda bt, d: (bt, 0, 0))

    kern = functools.partial(
        vit_fused_kernel, num_heads=H, head_dim=hd, n_true=N, n_pad=N_pad,
        batch_tile=BT, c_true=C, c_pad=CP)

    out = pl.pallas_call(
        kern,
        out_shape=jax.ShapeDtypeStruct((BTILES, BT, NCP), jnp.float32),
        grid=(BTILES, depth),
        in_specs=in_specs,
        out_specs=out_spec,
        scratch_shapes=[pltpu.VMEM((M, CP), jnp.float32)],        # resident activations
        compiler_params=pltpu.CompilerParams(
            dimension_semantics=("parallel", "arbitrary"),        # megacore on v7x
            vmem_limit_bytes=_vmem_limit_bytes()),
    )(patches, kp["tok_bias"], kp["patch_w"],
      kp["ln1_w"], kp["ln1_b"], kp["qkv_w"], kp["qkv_b"],
      kp["proj_w"], kp["proj_b"], kp["ln2_w"], kp["ln2_b"],
      kp["fc1_w"], kp["fc1_b"], kp["fc2_w"], kp["fc2_b"],
      kp["norm_w"], kp["norm_b"], kp["head_w"], kp["head_b"])

    return out.reshape(B, NCP)[:, :NC]


# ------------------------- pure-JAX reference (f32) ----------------------------

def _ln_ref(x, w, b, eps=1e-5):
    mu = jnp.mean(x, axis=-1, keepdims=True)
    var = jnp.mean((x - mu) ** 2, axis=-1, keepdims=True)
    return (x - mu) * jax.lax.rsqrt(var + eps) * w + b


def vit_forward_reference(x_nchw, pr, cfg):
    B, Cin, IMG, _ = x_nchw.shape
    PS = cfg["patch_size"]
    GH = IMG // PS
    P = GH * GH
    C = cfg["embed_dim"]
    H = cfg["num_heads"]
    hd = C // H
    K = Cin * PS * PS
    scale = hd ** (-0.5)

    patches = x_nchw.reshape(B, Cin, GH, PS, GH, PS)
    patches = patches.transpose(0, 2, 4, 1, 3, 5).reshape(B, P, K)
    emb = patches @ jnp.reshape(pr["conv_w"], (C, K)).T + pr["conv_b"]
    cls = jnp.broadcast_to(pr["cls"], (B, 1, C))
    x = jnp.concatenate([cls, emb], axis=1) + pr["pos"][None]

    for blk in pr["blocks"]:
        h = _ln_ref(x, blk["ln1_w"], blk["ln1_b"])
        qkv = h @ blk["qkv_w"].T + blk["qkv_b"]
        qkv = qkv.reshape(B, -1, 3, H, hd).transpose(2, 0, 3, 1, 4)
        q, k, v = qkv[0], qkv[1], qkv[2]
        s = jnp.einsum("bhnd,bhmd->bhnm", q, k) * scale
        p = jax.nn.softmax(s, axis=-1)
        o = jnp.einsum("bhnm,bhmd->bhnd", p, v)
        o = o.transpose(0, 2, 1, 3).reshape(B, -1, C)
        x = x + o @ blk["proj_w"].T + blk["proj_b"]
        h2 = _ln_ref(x, blk["ln2_w"], blk["ln2_b"])
        f = jax.nn.gelu(h2 @ blk["fc1_w"].T + blk["fc1_b"], approximate=False)
        x = x + f @ blk["fc2_w"].T + blk["fc2_b"]

    x = _ln_ref(x, pr["norm_w"], pr["norm_b"])
    return x[:, 0] @ pr["head_w"].T + pr["head_b"]


# ------------------------------------ main --------------------------------------

if __name__ == "__main__":
    # small ViT config
    B, Cin, IMG, PS = 2, 4, 16, 4
    EMBED, HEADS, DEPTH = 64, 4, 2
    MLP_HID = int(EMBED * 4.0)
    NUM_CLASSES = 16
    GH = IMG // PS
    P = GH * GH

    # batch tiling: keep >=2 programs on the "parallel" grid axis whenever B is
    # even (so v7x megacore can shard it); for large B pick BT so BT*N_pad ~ 256+.
    BT = B // 2 if (B >= 2 and B % 2 == 0) else B

    cfg = dict(in_channels=Cin, patch_size=PS, embed_dim=EMBED, num_heads=HEADS,
               depth=DEPTH, mlp_hidden=MLP_HID, num_classes=NUM_CLASSES,
               num_patches=P, batch=B, batch_tile=BT)

    key = jax.random.PRNGKey(0)

    def nrm(k, shape, s=0.02):
        return s * jax.random.normal(k, shape, jnp.float32)

    keys = iter(jax.random.split(key, 10 + DEPTH * 12))
    pr = {
        "conv_w": nrm(next(keys), (EMBED, Cin, PS, PS)),
        "conv_b": nrm(next(keys), (EMBED,)),
        "cls": nrm(next(keys), (EMBED,)),
        "pos": nrm(next(keys), (P + 1, EMBED)),
        "norm_w": 1.0 + nrm(next(keys), (EMBED,)),
        "norm_b": nrm(next(keys), (EMBED,)),
        "head_w": nrm(next(keys), (NUM_CLASSES, EMBED)),
        "head_b": nrm(next(keys), (NUM_CLASSES,)),
        "blocks": [],
    }
    for _ in range(DEPTH):
        pr["blocks"].append({
            "ln1_w": 1.0 + nrm(next(keys), (EMBED,)),
            "ln1_b": nrm(next(keys), (EMBED,)),
            "qkv_w": nrm(next(keys), (3 * EMBED, EMBED)),
            "qkv_b": nrm(next(keys), (3 * EMBED,)),
            "proj_w": nrm(next(keys), (EMBED, EMBED)),
            "proj_b": nrm(next(keys), (EMBED,)),
            "ln2_w": 1.0 + nrm(next(keys), (EMBED,)),
            "ln2_b": nrm(next(keys), (EMBED,)),
            "fc1_w": nrm(next(keys), (MLP_HID, EMBED)),
            "fc1_b": nrm(next(keys), (MLP_HID,)),
            "fc2_w": nrm(next(keys), (EMBED, MLP_HID)),
            "fc2_b": nrm(next(keys), (EMBED,)),
        })

    x = jax.random.normal(jax.random.PRNGKey(1), (B, Cin, IMG, IMG), jnp.float32)

    kp = pack_vit_params(pr, cfg)
    fwd = jax.jit(lambda xx, kpp: vit_forward_pallas(xx, kpp, cfg))
    logits = fwd(x, kp)
    jax.block_until_ready(logits)
    assert logits.shape == (B, NUM_CLASSES)

    # pure-JAX f32 reference (same semantics as the PyTorch module); bf16 matmul
    # operands in the kernel => loose tolerance.
    ref = vit_forward_reference(x, pr, cfg)
    err = float(jnp.max(jnp.abs(logits - ref)))
    assert err < 2e-2, f"max abs error vs reference too large: {err}"

    print("KERNEL_OK")
</pallas_src>

<mosaic_0001>
module attributes {stable_mosaic.version = 11 : i64} {
  func.func @vit_fused_kernel(%arg0: i32, %arg1: i32, %arg2: memref<1x24x128xbf16, #tpu.memory_space<vmem>>, %arg3: memref<24x128xf32, #tpu.memory_space<vmem>>, %arg4: memref<128x128xbf16, #tpu.memory_space<vmem>>, %arg5: memref<1x1x128xf32, #tpu.memory_space<vmem>>, %arg6: memref<1x1x128xf32, #tpu.memory_space<vmem>>, %arg7: memref<1x128x384xbf16, #tpu.memory_space<vmem>>, %arg8: memref<1x1x384xf32, #tpu.memory_space<vmem>>, %arg9: memref<1x128x128xbf16, #tpu.memory_space<vmem>>, %arg10: memref<1x1x128xf32, #tpu.memory_space<vmem>>, %arg11: memref<1x1x128xf32, #tpu.memory_space<vmem>>, %arg12: memref<1x1x128xf32, #tpu.memory_space<vmem>>, %arg13: memref<1x128x256xbf16, #tpu.memory_space<vmem>>, %arg14: memref<1x1x256xf32, #tpu.memory_space<vmem>>, %arg15: memref<1x256x128xbf16, #tpu.memory_space<vmem>>, %arg16: memref<1x1x128xf32, #tpu.memory_space<vmem>>, %arg17: memref<1x128xf32, #tpu.memory_space<vmem>>, %arg18: memref<1x128xf32, #tpu.memory_space<vmem>>, %arg19: memref<128x128xbf16, #tpu.memory_space<vmem>>, %arg20: memref<1x128xf32, #tpu.memory_space<vmem>>, %arg21: memref<1x1x128xf32, #tpu.memory_space<vmem>>, %arg22: memref<24x128xf32, #tpu.memory_space<vmem>>) attributes {dimension_semantics = [#tpu.dimension_semantics<parallel>, #tpu.dimension_semantics<arbitrary>], iteration_bounds = array<i64: 2, 2>, scalar_prefetch = 0 : i64, scratch_operands = 1 : i64, tpu.core_type = #tpu.core_type<tc>, window_params = [{transform_indices = @transform_0, window_bounds = array<i64: 1, 24, 128>}, {pipeline_mode = #tpu.pipeline_mode<synchronous>, transform_indices = @transform_1, window_bounds = array<i64: 24, 128>}, {pipeline_mode = #tpu.pipeline_mode<synchronous>, transform_indices = @transform_2, window_bounds = array<i64: 128, 128>}, {transform_indices = @transform_3, window_bounds = array<i64: 1, 1, 128>}, {transform_indices = @transform_4, window_bounds = array<i64: 1, 1, 128>}, {transform_indices = @transform_5, window_bounds = array<i64: 1, 128, 384>}, {transform_indices = @transform_6, window_bounds = array<i64: 1, 1, 384>}, {transform_indices = @transform_7, window_bounds = array<i64: 1, 128, 128>}, {transform_indices = @transform_8, window_bounds = array<i64: 1, 1, 128>}, {transform_indices = @transform_9, window_bounds = array<i64: 1, 1, 128>}, {transform_indices = @transform_10, window_bounds = array<i64: 1, 1, 128>}, {transform_indices = @transform_11, window_bounds = array<i64: 1, 128, 256>}, {transform_indices = @transform_12, window_bounds = array<i64: 1, 1, 256>}, {transform_indices = @transform_13, window_bounds = array<i64: 1, 256, 128>}, {transform_indices = @transform_14, window_bounds = array<i64: 1, 1, 128>}, {pipeline_mode = #tpu.pipeline_mode<synchronous>, transform_indices = @transform_15, window_bounds = array<i64: 1, 128>}, {pipeline_mode = #tpu.pipeline_mode<synchronous>, transform_indices = @transform_16, window_bounds = array<i64: 1, 128>}, {pipeline_mode = #tpu.pipeline_mode<synchronous>, transform_indices = @transform_17, window_bounds = array<i64: 128, 128>}, {pipeline_mode = #tpu.pipeline_mode<synchronous>, transform_indices = @transform_18, window_bounds = array<i64: 1, 128>}, {transform_indices = @transform_19, window_bounds = array<i64: 1, 1, 128>}]} {
    %c0_i32 = arith.constant 0 : i32
    %0 = arith.cmpi eq, %arg1, %c0_i32 : i32
    %1 = arith.extui %0 : i1 to i32
    %c0_i32_0 = arith.constant 0 : i32
    %2 = arith.cmpi ne, %1, %c0_i32_0 : i32
    scf.if %2 {
      %c0_81 = arith.constant 0 : index
      %c0_82 = arith.constant 0 : index
      %c0_83 = arith.constant 0 : index
      %199 = vector.load %arg2[%c0_81, %c0_82, %c0_83] : memref<1x24x128xbf16, #tpu.memory_space<vmem>>, vector<1x24x128xbf16>
      %200 = vector.shape_cast %199 : vector<1x24x128xbf16> to vector<24x128xbf16>
      %c0_84 = arith.constant 0 : index
      %c0_85 = arith.constant 0 : index
      %201 = vector.load %arg4[%c0_84, %c0_85] : memref<128x128xbf16, #tpu.memory_space<vmem>>, vector<128x128xbf16>
      %cst_86 = arith.constant dense<0.000000e+00> : vector<24x128xf32>
      %202 = tpu.matmul %200, %201, %cst_86 {dimension_numbers = #tpu.dot_dimension_numbers<[1], [0], [0], [1], [0, 0, 1, 1], [], []>} : vector<24x128xbf16>, vector<128x128xbf16>, vector<24x128xf32> -> vector<24x128xf32>
      %c0_87 = arith.constant 0 : index
      %c0_88 = arith.constant 0 : index
      %203 = vector.load %arg3[%c0_87, %c0_88] : memref<24x128xf32, #tpu.memory_space<vmem>>, vector<24x128xf32>
      %204 = arith.addf %202, %203 : vector<24x128xf32>
      %c0_89 = arith.constant 0 : index
      %c0_90 = arith.constant 0 : index
      %205 = vector.load %arg22[%c0_89, %c0_90] : memref<24x128xf32, #tpu.memory_space<vmem>>, vector<24x128xf32>
      tpu.vector_store %arg22[%c0_89, %c0_90], %204 {strides = array<i32>} : memref<24x128xf32, #tpu.memory_space<vmem>>, vector<24x128xf32>,
    } else {
    }
    %c0 = arith.constant 0 : index
    %c0_1 = arith.constant 0 : index
    %3 = vector.load %arg22[%c0, %c0_1] : memref<24x128xf32, #tpu.memory_space<vmem>>, vector<24x128xf32>
    %c0_2 = arith.constant 0 : index
    %c0_3 = arith.constant 0 : index
    %c0_4 = arith.constant 0 : index
    %4 = vector.load %arg5[%c0_2, %c0_3, %c0_4] : memref<1x1x128xf32, #tpu.memory_space<vmem>>, vector<1x1x128xf32>
    %5 = vector.shape_cast %4 : vector<1x1x128xf32> to vector<1x128xf32>
    %c0_5 = arith.constant 0 : index
    %c0_6 = arith.constant 0 : index
    %c0_7 = arith.constant 0 : index
    %6 = vector.load %arg6[%c0_5, %c0_6, %c0_7] : memref<1x1x128xf32, #tpu.memory_space<vmem>>, vector<1x1x128xf32>
    %7 = vector.shape_cast %6 : vector<1x1x128xf32> to vector<1x128xf32>
    %8 = tpu.iota {dimensions = array<i32: 1>} : vector<24x128xi32>
    %c64_i32 = arith.constant 64 : i32
    %9 = vector.broadcast %c64_i32 : i32 to vector<24x128xi32>
    %10 = arith.cmpi slt, %8, %9 : vector<24x128xi32>
    %cst = arith.constant dense<0.000000e+00> : vector<24xf32>
    %11 = vector.multi_reduction <add>, %3, %cst [1] : vector<24x128xf32> to vector<24xf32>
    %12 = vector.shape_cast %11 : vector<24xf32> to vector<24x1xf32>
    %cst_8 = arith.constant 1.562500e-02 : f32
    %13 = vector.broadcast %cst_8 : f32 to vector<24x1xf32>
    %14 = arith.mulf %12, %13 : vector<24x1xf32>
    %15 = vector.broadcast %14 : vector<24x1xf32> to vector<24x128xf32>
    %16 = arith.subf %3, %15 : vector<24x128xf32>
    %cst_9 = arith.constant 0.000000e+00 : f32
    %17 = vector.broadcast %cst_9 : f32 to vector<24x128xf32>
    %18 = arith.select %10, %16, %17 : vector<24x128xi1>, vector<24x128xf32>
    %19 = arith.mulf %18, %18 : vector<24x128xf32>
    %cst_10 = arith.constant dense<0.000000e+00> : vector<24xf32>
    %20 = vector.multi_reduction <add>, %19, %cst_10 [1] : vector<24x128xf32> to vector<24xf32>
    %21 = vector.shape_cast %20 : vector<24xf32> to vector<24x1xf32>
    %cst_11 = arith.constant 1.562500e-02 : f32
    %22 = vector.broadcast %cst_11 : f32 to vector<24x1xf32>
    %23 = arith.mulf %21, %22 : vector<24x1xf32>
    %cst_12 = arith.constant 9.99999974E-6 : f32
    %24 = vector.broadcast %cst_12 : f32 to vector<24x1xf32>
    %25 = arith.addf %23, %24 : vector<24x1xf32>
    %26 = math.rsqrt %25 : vector<24x1xf32>
    %27 = vector.broadcast %26 : vector<24x1xf32> to vector<24x128xf32>
    %28 = arith.mulf %18, %27 : vector<24x128xf32>
    %29 = vector.broadcast %5 : vector<1x128xf32> to vector<24x128xf32>
    %30 = arith.mulf %28, %29 : vector<24x128xf32>
    %31 = vector.broadcast %7 : vector<1x128xf32> to vector<24x128xf32>
    %32 = arith.addf %30, %31 : vector<24x128xf32>
    %33 = arith.truncf %32 : vector<24x128xf32> to vector<24x128xbf16>
    %c0_13 = arith.constant 0 : index
    %c0_14 = arith.constant 0 : index
    %c0_15 = arith.constant 0 : index
    %34 = vector.load %arg7[%c0_13, %c0_14, %c0_15] : memref<1x128x384xbf16, #tpu.memory_space<vmem>>, vector<1x128x384xbf16>
    %35 = vector.shape_cast %34 : vector<1x128x384xbf16> to vector<128x384xbf16>
    %cst_16 = arith.constant dense<0.000000e+00> : vector<24x384xf32>
    %36 = tpu.matmul %33, %35, %cst_16 {dimension_numbers = #tpu.dot_dimension_numbers<[1], [0], [0], [1], [0, 0, 1, 1], [], []>} : vector<24x128xbf16>, vector<128x384xbf16>, vector<24x384xf32> -> vector<24x384xf32>
    %c0_17 = arith.constant 0 : index
    %c0_18 = arith.constant 0 : index
    %c0_19 = arith.constant 0 : index
    %37 = vector.load %arg8[%c0_17, %c0_18, %c0_19] : memref<1x1x384xf32, #tpu.memory_space<vmem>>, vector<1x1x384xf32>
    %38 = vector.shape_cast %37 : vector<1x1x384xf32> to vector<1x384xf32>
    %39 = vector.broadcast %38 : vector<1x384xf32> to vector<24x384xf32>
    %40 = arith.addf %36, %39 : vector<24x384xf32>
    %41 = vector.shape_cast %40 : vector<24x384xf32> to vector<1x24x384xf32>
    %42 = tpu.iota {dimensions = array<i32: 2>} : vector<1x24x24xi32>
    %c17_i32 = arith.constant 17 : i32
    %43 = vector.broadcast %c17_i32 : i32 to vector<1x24x24xi32>
    %44 = arith.cmpi slt, %42, %43 : vector<1x24x24xi32>
    %45 = vector.extract_strided_slice %41 {offsets = [0, 0, 0], sizes = [1, 24, 16], strides = [1, 1, 1]} : vector<1x24x384xf32> to vector<1x24x16xf32>
    %46 = arith.truncf %45 : vector<1x24x16xf32> to vector<1x24x16xbf16>
    %47 = vector.extract_strided_slice %41 {offsets = [0, 0, 128], sizes = [1, 24, 16], strides = [1, 1, 1]} : vector<1x24x384xf32> to vector<1x24x16xf32>
    %48 = arith.truncf %47 : vector<1x24x16xf32> to vector<1x24x16xbf16>
    %49 = vector.extract_strided_slice %41 {offsets = [0, 0, 256], sizes = [1, 24, 16], strides = [1, 1, 1]} : vector<1x24x384xf32> to vector<1x24x16xf32>
    %50 = arith.truncf %49 : vector<1x24x16xf32> to vector<1x24x16xbf16>
    "tpu.trace_start"() <{level = 10 : i32, message = "bqd,bkd->bqk"}> : () -> ()
    %cst_20 = arith.constant dense<0.000000e+00> : vector<1x24x24xf32>
    %51 = tpu.matmul %46, %48, %cst_20 {dimension_numbers = #tpu.dot_dimension_numbers<[2], [2], [1], [1], [0, 0, 0, 1, 1, 1], [0], [0]>} : vector<1x24x16xbf16>, vector<1x24x16xbf16>, vector<1x24x24xf32> -> vector<1x24x24xf32>
    %cst_21 = arith.constant -1.000000e+30 : f32
    "tpu.trace_stop"() : () -> ()
    %52 = vector.broadcast %cst_21 : f32 to vector<1x24x24xf32>
    %53 = arith.select %44, %51, %52 : vector<1x24x24xi1>, vector<1x24x24xf32>
    %cst_22 = arith.constant dense<0xFF800000> : vector<1x24xf32>
    %54 = vector.multi_reduction <maximumf>, %53, %cst_22 [2] : vector<1x24x24xf32> to vector<1x24xf32>
    %55 = vector.shape_cast %54 : vector<1x24xf32> to vector<1x24x1xf32>
    %56 = vector.broadcast %55 : vector<1x24x1xf32> to vector<1x24x24xf32>
    %57 = arith.subf %53, %56 : vector<1x24x24xf32>
    %58 = math.exp %57 : vector<1x24x24xf32>
    %cst_23 = arith.constant dense<0.000000e+00> : vector<1x24xf32>
    %59 = vector.multi_reduction <add>, %58, %cst_23 [2] : vector<1x24x24xf32> to vector<1x24xf32>
    %60 = vector.shape_cast %59 : vector<1x24xf32> to vector<1x24x1xf32>
    %61 = tpu.reciprocal %60 {approx = true} : vector<1x24x1xf32> -> vector<1x24x1xf32>
    %62 = vector.broadcast %61 : vector<1x24x1xf32> to vector<1x24x24xf32>
    %63 = arith.mulf %58, %62 : vector<1x24x24xf32>
    %64 = arith.truncf %63 : vector<1x24x24xf32> to vector<1x24x24xbf16>
    "tpu.trace_start"() <{level = 10 : i32, message = "bqk,bkd->bqd"}> : () -> ()
    %cst_24 = arith.constant dense<0.000000e+00> : vector<1x24x16xf32>
    %65 = tpu.matmul %64, %50, %cst_24 {dimension_numbers = #tpu.dot_dimension_numbers<[2], [1], [1], [2], [0, 0, 0, 1, 1, 2], [0], [0]>} : vector<1x24x24xbf16>, vector<1x24x16xbf16>, vector<1x24x16xf32> -> vector<1x24x16xf32>
    "tpu.trace_stop"() : () -> ()
    %66 = vector.extract_strided_slice %41 {offsets = [0, 0, 16], sizes = [1, 24, 16], strides = [1, 1, 1]} : vector<1x24x384xf32> to vector<1x24x16xf32>
    %67 = arith.truncf %66 : vector<1x24x16xf32> to vector<1x24x16xbf16>
    %68 = vector.extract_strided_slice %41 {offsets = [0, 0, 144], sizes = [1, 24, 16], strides = [1, 1, 1]} : vector<1x24x384xf32> to vector<1x24x16xf32>
    %69 = arith.truncf %68 : vector<1x24x16xf32> to vector<1x24x16xbf16>
    %70 = vector.extract_strided_slice %41 {offsets = [0, 0, 272], sizes = [1, 24, 16], strides = [1, 1, 1]} : vector<1x24x384xf32> to vector<1x24x16xf32>
    %71 = arith.truncf %70 : vector<1x24x16xf32> to vector<1x24x16xbf16>
    "tpu.trace_start"() <{level = 10 : i32, message = "bqd,bkd->bqk"}> : () -> ()
    %cst_25 = arith.constant dense<0.000000e+00> : vector<1x24x24xf32>
    %72 = tpu.matmul %67, %69, %cst_25 {dimension_numbers = #tpu.dot_dimension_numbers<[2], [2], [1], [1], [0, 0, 0, 1, 1, 1], [0], [0]>} : vector<1x24x16xbf16>, vector<1x24x16xbf16>, vector<1x24x24xf32> -> vector<1x24x24xf32>
    %cst_26 = arith.constant -1.000000e+30 : f32
    "tpu.trace_stop"() : () -> ()
    %73 = vector.broadcast %cst_26 : f32 to vector<1x24x24xf32>
    %74 = arith.select %44, %72, %73 : vector<1x24x24xi1>, vector<1x24x24xf32>
    %cst_27 = arith.constant dense<0xFF800000> : vector<1x24xf32>
    %75 = vector.multi_reduction <maximumf>, %74, %cst_27 [2] : vector<1x24x24xf32> to vector<1x24xf32>
    %76 = vector.shape_cast %75 : vector<1x24xf32> to vector<1x24x1xf32>
    %77 = vector.broadcast %76 : vector<1x24x1xf32> to vector<1x24x24xf32>
    %78 = arith.subf %74, %77 : vector<1x24x24xf32>
    %79 = math.exp %78 : vector<1x24x24xf32>
    %cst_28 = arith.constant dense<0.000000e+00> : vector<1x24xf32>
    %80 = vector.multi_reduction <add>, %79, %cst_28 [2] : vector<1x24x24xf32> to vector<1x24xf32>
    %81 = vector.shape_cast %80 : vector<1x24xf32> to vector<1x24x1xf32>
    %82 = tpu.reciprocal %81 {approx = true} : vector<1x24x1xf32> -> vector<1x24x1xf32>
    %83 = vector.broadcast %82 : vector<1x24x1xf32> to vector<1x24x24xf32>
    %84 = arith.mulf %79, %83 : vector<1x24x24xf32>
    %85 = arith.truncf %84 : vector<1x24x24xf32> to vector<1x24x24xbf16>
    "tpu.trace_start"() <{level = 10 : i32, message = "bqk,bkd->bqd"}> : () -> ()
    %cst_29 = arith.constant dense<0.000000e+00> : vector<1x24x16xf32>
    %86 = tpu.matmul %85, %71, %cst_29 {dimension_numbers = #tpu.dot_dimension_numbers<[2], [1], [1], [2], [0, 0, 0, 1, 1, 2], [0], [0]>} : vector<1x24x24xbf16>, vector<1x24x16xbf16>, vector<1x24x16xf32> -> vector<1x24x16xf32>
    "tpu.trace_stop"() : () -> ()
    %87 = vector.extract_strided_slice %41 {offsets = [0, 0, 32], sizes = [1, 24, 16], strides = [1, 1, 1]} : vector<1x24x384xf32> to vector<1x24x16xf32>
    %88 = arith.truncf %87 : vector<1x24x16xf32> to vector<1x24x16xbf16>
    %89 = vector.extract_strided_slice %41 {offsets = [0, 0, 160], sizes = [1, 24, 16], strides = [1, 1, 1]} : vector<1x24x384xf32> to vector<1x24x16xf32>
    %90 = arith.truncf %89 : vector<1x24x16xf32> to vector<1x24x16xbf16>
    %91 = vector.extract_strided_slice %41 {offsets = [0, 0, 288], sizes = [1, 24, 16], strides = [1, 1, 1]} : vector<1x24x384xf32> to vector<1x24x16xf32>
    %92 = arith.truncf %91 : vector<1x24x16xf32> to vector<1x24x16xbf16>
    "tpu.trace_start"() <{level = 10 : i32, message = "bqd,bkd->bqk"}> : () -> ()
    %cst_30 = arith.constant dense<0.000000e+00> : vector<1x24x24xf32>
    %93 = tpu.matmul %88, %90, %cst_30 {dimension_numbers = #tpu.dot_dimension_numbers<[2], [2], [1], [1], [0, 0, 0, 1, 1, 1], [0], [0]>} : vector<1x24x16xbf16>, vector<1x24x16xbf16>, vector<1x24x24xf32> -> vector<1x24x24xf32>
    %cst_31 = arith.constant -1.000000e+30 : f32
    "tpu.trace_stop"() : () -> ()
    %94 = vector.broadcast %cst_31 : f32 to vector<1x24x24xf32>
    %95 = arith.select %44, %93, %94 : vector<1x24x24xi1>, vector<1x24x24xf32>
    %cst_32 = arith.constant dense<0xFF800000> : vector<1x24xf32>
    %96 = vector.multi_reduction <maximumf>, %95, %cst_32 [2] : vector<1x24x24xf32> to vector<1x24xf32>
    %97 = vector.shape_cast %96 : vector<1x24xf32> to vector<1x24x1xf32>
    %98 = vector.broadcast %97 : vector<1x24x1xf32> to vector<1x24x24xf32>
    %99 = arith.subf %95, %98 : vector<1x24x24xf32>
    %100 = math.exp %99 : vector<1x24x24xf32>
    %cst_33 = arith.constant dense<0.000000e+00> : vector<1x24xf32>
    %101 = vector.multi_reduction <add>, %100, %cst_33 [2] : vector<1x24x24xf32> to vector<1x24xf32>
    %102 = vector.shape_cast %101 : vector<1x24xf32> to vector<1x24x1xf32>
    %103 = tpu.reciprocal %102 {approx = true} : vector<1x24x1xf32> -> vector<1x24x1xf32>
    %104 = vector.broadcast %103 : vector<1x24x1xf32> to vector<1x24x24xf32>
    %105 = arith.mulf %100, %104 : vector<1x24x24xf32>
    %106 = arith.truncf %105 : vector<1x24x24xf32> to vector<1x24x24xbf16>
    "tpu.trace_start"() <{level = 10 : i32, message = "bqk,bkd->bqd"}> : () -> ()
    %cst_34 = arith.constant dense<0.000000e+00> : vector<1x24x16xf32>
    %107 = tpu.matmul %106, %92, %cst_34 {dimension_numbers = #tpu.dot_dimension_numbers<[2], [1], [1], [2], [0, 0, 0, 1, 1, 2], [0], [0]>} : vector<1x24x24xbf16>, vector<1x24x16xbf16>, vector<1x24x16xf32> -> vector<1x24x16xf32>
    "tpu.trace_stop"() : () -> ()
    %108 = vector.extract_strided_slice %41 {offsets = [0, 0, 48], sizes = [1, 24, 16], strides = [1, 1, 1]} : vector<1x24x384xf32> to vector<1x24x16xf32>
    %109 = arith.truncf %108 : vector<1x24x16xf32> to vector<1x24x16xbf16>
    %110 = vector.extract_strided_slice %41 {offsets = [0, 0, 176], sizes = [1, 24, 16], strides = [1, 1, 1]} : vector<1x24x384xf32> to vector<1x24x16xf32>
    %111 = arith.truncf %110 : vector<1x24x16xf32> to vector<1x24x16xbf16>
    %112 = vector.extract_strided_slice %41 {offsets = [0, 0, 304], sizes = [1, 24, 16], strides = [1, 1, 1]} : vector<1x24x384xf32> to vector<1x24x16xf32>
    %113 = arith.truncf %112 : vector<1x24x16xf32> to vector<1x24x16xbf16>
    "tpu.trace_start"() <{level = 10 : i32, message = "bqd,bkd->bqk"}> : () -> ()
    %cst_35 = arith.constant dense<0.000000e+00> : vector<1x24x24xf32>
    %114 = tpu.matmul %109, %111, %cst_35 {dimension_numbers = #tpu.dot_dimension_numbers<[2], [2], [1], [1], [0, 0, 0, 1, 1, 1], [0], [0]>} : vector<1x24x16xbf16>, vector<1x24x16xbf16>, vector<1x24x24xf32> -> vector<1x24x24xf32>
    %cst_36 = arith.constant -1.000000e+30 : f32
    "tpu.trace_stop"() : () -> ()
    %115 = vector.broadcast %cst_36 : f32 to vector<1x24x24xf32>
    %116 = arith.select %44, %114, %115 : vector<1x24x24xi1>, vector<1x24x24xf32>
    %cst_37 = arith.constant dense<0xFF800000> : vector<1x24xf32>
    %117 = vector.multi_reduction <maximumf>, %116, %cst_37 [2] : vector<1x24x24xf32> to vector<1x24xf32>
    %118 = vector.shape_cast %117 : vector<1x24xf32> to vector<1x24x1xf32>
    %119 = vector.broadcast %118 : vector<1x24x1xf32> to vector<1x24x24xf32>
    %120 = arith.subf %116, %119 : vector<1x24x24xf32>
    %121 = math.exp %120 : vector<1x24x24xf32>
    %cst_38 = arith.constant dense<0.000000e+00> : vector<1x24xf32>
    %122 = vector.multi_reduction <add>, %121, %cst_38 [2] : vector<1x24x24xf32> to vector<1x24xf32>
    %123 = vector.shape_cast %122 : vector<1x24xf32> to vector<1x24x1xf32>
    %124 = tpu.reciprocal %123 {approx = true} : vector<1x24x1xf32> -> vector<1x24x1xf32>
    %125 = vector.broadcast %124 : vector<1x24x1xf32> to vector<1x24x24xf32>
    %126 = arith.mulf %121, %125 : vector<1x24x24xf32>
    %127 = arith.truncf %126 : vector<1x24x24xf32> to vector<1x24x24xbf16>
    "tpu.trace_start"() <{level = 10 : i32, message = "bqk,bkd->bqd"}> : () -> ()
    %cst_39 = arith.constant dense<0.000000e+00> : vector<1x24x16xf32>
    %128 = tpu.matmul %127, %113, %cst_39 {dimension_numbers = #tpu.dot_dimension_numbers<[2], [1], [1], [2], [0, 0, 0, 1, 1, 2], [0], [0]>} : vector<1x24x24xbf16>, vector<1x24x16xbf16>, vector<1x24x16xf32> -> vector<1x24x16xf32>
    %cst_40 = arith.constant 0.000000e+00 : f32
    "tpu.trace_stop"() : () -> ()
    %129 = vector.broadcast %cst_40 : f32 to vector<1x24x64xf32>
    %130 = tpu.concatenate %65, %86, %107, %128, %129 in 2 : vector<1x24x16xf32>, vector<1x24x16xf32>, vector<1x24x16xf32>, vector<1x24x16xf32>, vector<1x24x64xf32> -> vector<1x24x128xf32>
    %131 = vector.shape_cast %130 : vector<1x24x128xf32> to vector<24x128xf32>
    %132 = arith.truncf %131 : vector<24x128xf32> to vector<24x128xbf16>
    %c0_41 = arith.constant 0 : index
    %c0_42 = arith.constant 0 : index
    %c0_43 = arith.constant 0 : index
    %133 = vector.load %arg9[%c0_41, %c0_42, %c0_43] : memref<1x128x128xbf16, #tpu.memory_space<vmem>>, vector<1x128x128xbf16>
    %134 = vector.shape_cast %133 : vector<1x128x128xbf16> to vector<128x128xbf16>
    %cst_44 = arith.constant dense<0.000000e+00> : vector<24x128xf32>
    %135 = tpu.matmul %132, %134, %cst_44 {dimension_numbers = #tpu.dot_dimension_numbers<[1], [0], [0], [1], [0, 0, 1, 1], [], []>} : vector<24x128xbf16>, vector<128x128xbf16>, vector<24x128xf32> -> vector<24x128xf32>
    %136 = arith.addf %3, %135 : vector<24x128xf32>
    %c0_45 = arith.constant 0 : index
    %c0_46 = arith.constant 0 : index
    %c0_47 = arith.constant 0 : index
    %137 = vector.load %arg10[%c0_45, %c0_46, %c0_47] : memref<1x1x128xf32, #tpu.memory_space<vmem>>, vector<1x1x128xf32>
    %138 = vector.shape_cast %137 : vector<1x1x128xf32> to vector<1x128xf32>
    %139 = vector.broadcast %138 : vector<1x128xf32> to vector<24x128xf32>
    %140 = arith.addf %136, %139 : vector<24x128xf32>
    %c0_48 = arith.constant 0 : index
    %c0_49 = arith.constant 0 : index
    %c0_50 = arith.constant 0 : index
    %141 = vector.load %arg11[%c0_48, %c0_49, %c0_50] : memref<1x1x128xf32, #tpu.memory_space<vmem>>, vector<1x1x128xf32>
    %142 = vector.shape_cast %141 : vector<1x1x128xf32> to vector<1x128xf32>
    %c0_51 = arith.constant 0 : index
    %c0_52 = arith.constant 0 : index
    %c0_53 = arith.constant 0 : index
    %143 = vector.load %arg12[%c0_51, %c0_52, %c0_53] : memref<1x1x128xf32, #tpu.memory_space<vmem>>, vector<1x1x128xf32>
    %144 = vector.shape_cast %143 : vector<1x1x128xf32> to vector<1x128xf32>
    %145 = tpu.iota {dimensions = array<i32: 1>} : vector<24x128xi32>
    %c64_i32_54 = arith.constant 64 : i32
    %146 = vector.broadcast %c64_i32_54 : i32 to vector<24x128xi32>
    %147 = arith.cmpi slt, %145, %146 : vector<24x128xi32>
    %cst_55 = arith.constant dense<0.000000e+00> : vector<24xf32>
    %148 = vector.multi_reduction <add>, %140, %cst_55 [1] : vector<24x128xf32> to vector<24xf32>
    %149 = vector.shape_cast %148 : vector<24xf32> to vector<24x1xf32>
    %cst_56 = arith.constant 1.562500e-02 : f32
    %150 = vector.broadcast %cst_56 : f32 to vector<24x1xf32>
    %151 = arith.mulf %149, %150 : vector<24x1xf32>
    %152 = vector.broadcast %151 : vector<24x1xf32> to vector<24x128xf32>
    %153 = arith.subf %140, %152 : vector<24x128xf32>
    %cst_57 = arith.constant 0.000000e+00 : f32
    %154 = vector.broadcast %cst_57 : f32 to vector<24x128xf32>
    %155 = arith.select %147, %153, %154 : vector<24x128xi1>, vector<24x128xf32>
    %156 = arith.mulf %155, %155 : vector<24x128xf32>
    %cst_58 = arith.constant dense<0.000000e+00> : vector<24xf32>
    %157 = vector.multi_reduction <add>, %156, %cst_58 [1] : vector<24x128xf32> to vector<24xf32>
    %158 = vector.shape_cast %157 : vector<24xf32> to vector<24x1xf32>
    %cst_59 = arith.constant 1.562500e-02 : f32
    %159 = vector.broadcast %cst_59 : f32 to vector<24x1xf32>
    %160 = arith.mulf %158, %159 : vector<24x1xf32>
    %cst_60 = arith.constant 9.99999974E-6 : f32
    %161 = vector.broadcast %cst_60 : f32 to vector<24x1xf32>
    %162 = arith.addf %160, %161 : vector<24x1xf32>
    %163 = math.rsqrt %162 : vector<24x1xf32>
    %164 = vector.broadcast %163 : vector<24x1xf32> to vector<24x128xf32>
    %165 = arith.mulf %155, %164 : vector<24x128xf32>
    %166 = vector.broadcast %142 : vector<1x128xf32> to vector<24x128xf32>
    %167 = arith.mulf %165, %166 : vector<24x128xf32>
    %168 = vector.broadcast %144 : vector<1x128xf32> to vector<24x128xf32>
    %169 = arith.addf %167, %168 : vector<24x128xf32>
    %170 = arith.truncf %169 : vector<24x128xf32> to vector<24x128xbf16>
    %c0_61 = arith.constant 0 : index
    %c0_62 = arith.constant 0 : index
    %c0_63 = arith.constant 0 : index
    %171 = vector.load %arg13[%c0_61, %c0_62, %c0_63] : memref<1x128x256xbf16, #tpu.memory_space<vmem>>, vector<1x128x256xbf16>
    %172 = vector.shape_cast %171 : vector<1x128x256xbf16> to vector<128x256xbf16>
    %cst_64 = arith.constant dense<0.000000e+00> : vector<24x256xf32>
    %173 = tpu.matmul %170, %172, %cst_64 {dimension_numbers = #tpu.dot_dimension_numbers<[1], [0], [0], [1], [0, 0, 1, 1], [], []>} : vector<24x128xbf16>, vector<128x256xbf16>, vector<24x256xf32> -> vector<24x256xf32>
    %c0_65 = arith.constant 0 : index
    %c0_66 = arith.constant 0 : index
    %c0_67 = arith.constant 0 : index
    %174 = vector.load %arg14[%c0_65, %c0_66, %c0_67] : memref<1x1x256xf32, #tpu.memory_space<vmem>>, vector<1x1x256xf32>
    %175 = vector.shape_cast %174 : vector<1x1x256xf32> to vector<1x256xf32>
    %176 = vector.broadcast %175 : vector<1x256xf32> to vector<24x256xf32>
    %177 = arith.addf %173, %176 : vector<24x256xf32>
    %cst_68 = arith.constant 5.000000e-01 : f32
    %178 = vector.broadcast %cst_68 : f32 to vector<24x256xf32>
    %179 = arith.mulf %178, %177 : vector<24x256xf32>
    %cst_69 = arith.constant 0.707106769 : f32
    %180 = vector.broadcast %cst_69 : f32 to vector<24x256xf32>
    %181 = arith.mulf %177, %180 : vector<24x256xf32>
    %182 = math.erf %181 : vector<24x256xf32>
    %cst_70 = arith.constant 1.000000e+00 : f32
    %183 = vector.broadcast %cst_70 : f32 to vector<24x256xf32>
    %184 = arith.addf %183, %182 : vector<24x256xf32>
    %185 = arith.mulf %179, %184 : vector<24x256xf32>
    %186 = arith.truncf %185 : vector<24x256xf32> to vector<24x256xbf16>
    %c0_71 = arith.constant 0 : index
    %c0_72 = arith.constant 0 : index
    %c0_73 = arith.constant 0 : index
    %187 = vector.load %arg15[%c0_71, %c0_72, %c0_73] : memref<1x256x128xbf16, #tpu.memory_space<vmem>>, vector<1x256x128xbf16>
    %188 = vector.shape_cast %187 : vector<1x256x128xbf16> to vector<256x128xbf16>
    %cst_74 = arith.constant dense<0.000000e+00> : vector<24x128xf32>
    %189 = tpu.matmul %186, %188, %cst_74 {dimension_numbers = #tpu.dot_dimension_numbers<[1], [0], [0], [1], [0, 0, 1, 1], [], []>} : vector<24x256xbf16>, vector<256x128xbf16>, vector<24x128xf32> -> vector<24x128xf32>
    %c0_75 = arith.constant 0 : index
    %c0_76 = arith.constant 0 : index
    %c0_77 = arith.constant 0 : index
    %190 = vector.load %arg16[%c0_75, %c0_76, %c0_77] : memref<1x1x128xf32, #tpu.memory_space<vmem>>, vector<1x1x128xf32>
    %191 = vector.shape_cast %190 : vector<1x1x128xf32> to vector<1x128xf32>
    %192 = vector.broadcast %191 : vector<1x128xf32> to vector<24x128xf32>
    %193 = arith.addf %189, %192 : vector<24x128xf32>
    %194 = arith.addf %140, %193 : vector<24x128xf32>
    %c0_78 = arith.constant 0 : index
    %c0_79 = arith.constant 0 : index
    %195 = vector.load %arg22[%c0_78, %c0_79] : memref<24x128xf32, #tpu.memory_space<vmem>>, vector<24x128xf32>
    tpu.vector_store %arg22[%c0_78, %c0_79], %194 {strides = array<i32>} : memref<24x128xf32, #tpu.memory_space<vmem>>, vector<24x128xf32>,
    %c1_i32 = arith.constant 1 : i32
    %196 = arith.cmpi eq, %arg1, %c1_i32 : i32
    %197 = arith.extui %196 : i1 to i32
    %c0_i32_80 = arith.constant 0 : i32
    %198 = arith.cmpi ne, %197, %c0_i32_80 : i32
    scf.if %198 {
      %199 = vector.extract_strided_slice %194 {offsets = [0, 0], sizes = [1, 128], strides = [1, 1]} : vector<24x128xf32> to vector<1x128xf32>
      %c0_81 = arith.constant 0 : index
      %c0_82 = arith.constant 0 : index
      %200 = vector.load %arg17[%c0_81, %c0_82] : memref<1x128xf32, #tpu.memory_space<vmem>>, vector<1x128xf32>
      %c0_83 = arith.constant 0 : index
      %c0_84 = arith.constant 0 : index
      %201 = vector.load %arg18[%c0_83, %c0_84] : memref<1x128xf32, #tpu.memory_space<vmem>>, vector<1x128xf32>
      %202 = tpu.iota {dimensions = array<i32: 1>} : vector<1x128xi32>
      %c64_i32_85 = arith.constant 64 : i32
      %203 = vector.broadcast %c64_i32_85 : i32 to vector<1x128xi32>
      %204 = arith.cmpi slt, %202, %203 : vector<1x128xi32>
      %cst_86 = arith.constant dense<0.000000e+00> : vector<1xf32>
      %205 = vector.multi_reduction <add>, %199, %cst_86 [1] : vector<1x128xf32> to vector<1xf32>
      %206 = vector.shape_cast %205 : vector<1xf32> to vector<1x1xf32>
      %cst_87 = arith.constant 1.562500e-02 : f32
      %207 = vector.broadcast %cst_87 : f32 to vector<1x1xf32>
      %208 = arith.mulf %206, %207 : vector<1x1xf32>
      %209 = vector.broadcast %208 : vector<1x1xf32> to vector<1x128xf32>
      %210 = arith.subf %199, %209 : vector<1x128xf32>
      %cst_88 = arith.constant 0.000000e+00 : f32
      %211 = vector.broadcast %cst_88 : f32 to vector<1x128xf32>
      %212 = arith.select %204, %210, %211 : vector<1x128xi1>, vector<1x128xf32>
      %213 = arith.mulf %212, %212 : vector<1x128xf32>
      %cst_89 = arith.constant dense<0.000000e+00> : vector<1xf32>
      %214 = vector.multi_reduction <add>, %213, %cst_89 [1] : vector<1x128xf32> to vector<1xf32>
      %215 = vector.shape_cast %214 : vector<1xf32> to vector<1x1xf32>
      %cst_90 = arith.constant 1.562500e-02 : f32
      %216 = vector.broadcast %cst_90 : f32 to vector<1x1xf32>
      %217 = arith.mulf %215, %216 : vector<1x1xf32>
      %cst_91 = arith.constant 9.99999974E-6 : f32
      %218 = vector.broadcast %cst_91 : f32 to vector<1x1xf32>
      %219 = arith.addf %217, %218 : vector<1x1xf32>
      %220 = math.rsqrt %219 : vector<1x1xf32>
      %221 = vector.broadcast %220 : vector<1x1xf32> to vector<1x128xf32>
      %222 = arith.mulf %212, %221 : vector<1x128xf32>
      %223 = arith.mulf %222, %200 : vector<1x128xf32>
      %224 = arith.addf %223, %201 : vector<1x128xf32>
      %225 = arith.truncf %224 : vector<1x128xf32> to vector<1x128xbf16>
      %c0_92 = arith.constant 0 : index
      %c0_93 = arith.constant 0 : index
      %226 = vector.load %arg19[%c0_92, %c0_93] : memref<128x128xbf16, #tpu.memory_space<vmem>>, vector<128x128xbf16>
      %cst_94 = arith.constant dense<0.000000e+00> : vector<1x128xf32>
      %227 = tpu.matmul %225, %226, %cst_94 {dimension_numbers = #tpu.dot_dimension_numbers<[1], [0], [0], [1], [0, 0, 1, 1], [], []>} : vector<1x128xbf16>, vector<128x128xbf16>, vector<1x128xf32> -> vector<1x128xf32>
      %c0_95 = arith.constant 0 : index
      %c0_96 = arith.constant 0 : index
      %228 = vector.load %arg20[%c0_95, %c0_96] : memref<1x128xf32, #tpu.memory_space<vmem>>, vector<1x128xf32>
      %229 = arith.addf %227, %228 : vector<1x128xf32>
      %c0_97 = arith.constant 0 : index
      %c0_98 = arith.constant 0 : index
      %c0_99 = arith.constant 0 : index
      %230 = vector.load %arg21[%c0_97, %c0_98, %c0_99] : memref<1x1x128xf32, #tpu.memory_space<vmem>>, vector<1x1x128xf32>
      %231 = vector.shape_cast %230 : vector<1x1x128xf32> to vector<1x128xf32>
      %232 = vector.shape_cast %229 : vector<1x128xf32> to vector<1x1x128xf32>
      tpu.vector_store %arg21[%c0_97, %c0_98, %c0_99], %232 {strides = array<i32>} : memref<1x1x128xf32, #tpu.memory_space<vmem>>, vector<1x1x128xf32>,
    } else {
    }
    return
  }
  func.func @transform_0(%arg0: i32, %arg1: i32) -> (i32, i32, i32) {
    %c0_i32 = arith.constant 0 : i32
    %c0_i32_0 = arith.constant 0 : i32
    %c0_i32_1 = arith.constant 0 : i32
    return %arg0, %c0_i32, %c0_i32_0 : i32, i32, i32
  }
  func.func @transform_1(%arg0: i32, %arg1: i32) -> (i32, i32) {
    %c0_i32 = arith.constant 0 : i32
    %c0_i32_0 = arith.constant 0 : i32
    %c0_i32_1 = arith.constant 0 : i32
    return %c0_i32, %c0_i32_0 : i32, i32
  }
  func.func @transform_2(%arg0: i32, %arg1: i32) -> (i32, i32) {
    %c0_i32 = arith.constant 0 : i32
    %c0_i32_0 = arith.constant 0 : i32
    %c0_i32_1 = arith.constant 0 : i32
    return %c0_i32, %c0_i32_0 : i32, i32
  }
  func.func @transform_3(%arg0: i32, %arg1: i32) -> (i32, i32, i32) {
    %c0_i32 = arith.constant 0 : i32
    %c0_i32_0 = arith.constant 0 : i32
    %c0_i32_1 = arith.constant 0 : i32
    return %arg1, %c0_i32, %c0_i32_0 : i32, i32, i32
  }
  func.func @transform_4(%arg0: i32, %arg1: i32) -> (i32, i32, i32) {
    %c0_i32 = arith.constant 0 : i32
    %c0_i32_0 = arith.constant 0 : i32
    %c0_i32_1 = arith.constant 0 : i32
    return %arg1, %c0_i32, %c0_i32_0 : i32, i32, i32
  }
  func.func @transform_5(%arg0: i32, %arg1: i32) -> (i32, i32, i32) {
    %c0_i32 = arith.constant 0 : i32
    %c0_i32_0 = arith.constant 0 : i32
    %c0_i32_1 = arith.constant 0 : i32
    return %arg1, %c0_i32, %c0_i32_0 : i32, i32, i32
  }
  func.func @transform_6(%arg0: i32, %arg1: i32) -> (i32, i32, i32) {
    %c0_i32 = arith.constant 0 : i32
    %c0_i32_0 = arith.constant 0 : i32
    %c0_i32_1 = arith.constant 0 : i32
    return %arg1, %c0_i32, %c0_i32_0 : i32, i32, i32
  }
  func.func @transform_7(%arg0: i32, %arg1: i32) -> (i32, i32, i32) {
    %c0_i32 = arith.constant 0 : i32
    %c0_i32_0 = arith.constant 0 : i32
    %c0_i32_1 = arith.constant 0 : i32
    return %arg1, %c0_i32, %c0_i32_0 : i32, i32, i32
  }
  func.func @transform_8(%arg0: i32, %arg1: i32) -> (i32, i32, i32) {
    %c0_i32 = arith.constant 0 : i32
    %c0_i32_0 = arith.constant 0 : i32
    %c0_i32_1 = arith.constant 0 : i32
    return %arg1, %c0_i32, %c0_i32_0 : i32, i32, i32
  }
  func.func @transform_9(%arg0: i32, %arg1: i32) -> (i32, i32, i32) {
    %c0_i32 = arith.constant 0 : i32
    %c0_i32_0 = arith.constant 0 : i32
    %c0_i32_1 = arith.constant 0 : i32
    return %arg1, %c0_i32, %c0_i32_0 : i32, i32, i32
  }
  func.func @transform_10(%arg0: i32, %arg1: i32) -> (i32, i32, i32) {
    %c0_i32 = arith.constant 0 : i32
    %c0_i32_0 = arith.constant 0 : i32
    %c0_i32_1 = arith.constant 0 : i32
    return %arg1, %c0_i32, %c0_i32_0 : i32, i32, i32
  }
  func.func @transform_11(%arg0: i32, %arg1: i32) -> (i32, i32, i32) {
    %c0_i32 = arith.constant 0 : i32
    %c0_i32_0 = arith.constant 0 : i32
    %c0_i32_1 = arith.constant 0 : i32
    return %arg1, %c0_i32, %c0_i32_0 : i32, i32, i32
  }
  func.func @transform_12(%arg0: i32, %arg1: i32) -> (i32, i32, i32) {
    %c0_i32 = arith.constant 0 : i32
    %c0_i32_0 = arith.constant 0 : i32
    %c0_i32_1 = arith.constant 0 : i32
    return %arg1, %c0_i32, %c0_i32_0 : i32, i32, i32
  }
  func.func @transform_13(%arg0: i32, %arg1: i32) -> (i32, i32, i32) {
    %c0_i32 = arith.constant 0 : i32
    %c0_i32_0 = arith.constant 0 : i32
    %c0_i32_1 = arith.constant 0 : i32
    return %arg1, %c0_i32, %c0_i32_0 : i32, i32, i32
  }
  func.func @transform_14(%arg0: i32, %arg1: i32) -> (i32, i32, i32) {
    %c0_i32 = arith.constant 0 : i32
    %c0_i32_0 = arith.constant 0 : i32
    %c0_i32_1 = arith.constant 0 : i32
    return %arg1, %c0_i32, %c0_i32_0 : i32, i32, i32
  }
  func.func @transform_15(%arg0: i32, %arg1: i32) -> (i32, i32) {
    %c0_i32 = arith.constant 0 : i32
    %c0_i32_0 = arith.constant 0 : i32
    %c0_i32_1 = arith.constant 0 : i32
    return %c0_i32, %c0_i32_0 : i32, i32
  }
  func.func @transform_16(%arg0: i32, %arg1: i32) -> (i32, i32) {
    %c0_i32 = arith.constant 0 : i32
    %c0_i32_0 = arith.constant 0 : i32
    %c0_i32_1 = arith.constant 0 : i32
    return %c0_i32, %c0_i32_0 : i32, i32
  }
  func.func @transform_17(%arg0: i32, %arg1: i32) -> (i32, i32) {
    %c0_i32 = arith.constant 0 : i32
    %c0_i32_0 = arith.constant 0 : i32
    %c0_i32_1 = arith.constant 0 : i32
    return %c0_i32, %c0_i32_0 : i32, i32
  }
  func.func @transform_18(%arg0: i32, %arg1: i32) -> (i32, i32) {
    %c0_i32 = arith.constant 0 : i32
    %c0_i32_0 = arith.constant 0 : i32
    %c0_i32_1 = arith.constant 0 : i32
    return %c0_i32, %c0_i32_0 : i32, i32
  }
  func.func @transform_19(%arg0: i32, %arg1: i32) -> (i32, i32, i32) {
    %c0_i32 = arith.constant 0 : i32
    %c0_i32_0 = arith.constant 0 : i32
    %c0_i32_1 = arith.constant 0 : i32
    return %arg0, %c0_i32, %c0_i32_0 : i32, i32, i32
  }
}

</mosaic_0001>

<bundles_post_ra>
// kernel: _lambda_.1
= control target key start
LH: loop header
LB: loop body
LE: loop exit
PB: predicated region body
PF: predicated region fallthrough
CT: control target
= control target key end

     0   :  { %s4486_s0 = inlined_call_operand.vmem [shape: bf16[2,24,128], index: 0, kind: input, shape index: {}]   ;;  %s4487_s1 = inlined_call_operand.vmem [shape: f32[24,128], index: 1, kind: input, shape index: {}]   ;;  %s4488_s2 = inlined_call_operand.vmem [shape: bf16[128,128], index: 2, kind: input, shape index: {}]   ;;  %s4489_s3 = inlined_call_operand.vmem [shape: f32[2,1,128], index: 3, kind: input, shape index: {}]   ;;  %s4490_s4 = inlined_call_operand.vmem [shape: f32[2,1,128], index: 4, kind: input, shape index: {}]   ;;  %s4491_s5 = inlined_call_operand.vmem [shape: bf16[2,128,384], index: 5, kind: input, shape index: {}]   ;;  %s4492_s6 = inlined_call_operand.vmem [shape: f32[2,1,384], index: 6, kind: input, shape index: {}]   ;;  %s4493_s7 = inlined_call_operand.vmem [shape: bf16[2,128,128], index: 7, kind: input, shape index: {}]   ;;  %s4494_s8 = inlined_call_operand.vmem [shape: f32[2,1,128], index: 8, kind: input, shape index: {}]   ;;  %s4495_s9 = inlined_call_operand.vmem [shape: f32[2,1,128], index: 9, kind: input, shape index: {}]   ;;  %s4496_s10 = inlined_call_operand.vmem [shape: f32[2,1,128], index: 10, kind: input, shape index: {}]   ;;  %s4497_s11 = inlined_call_operand.vmem [shape: bf16[2,128,256], index: 11, kind: input, shape index: {}]   ;;  %s4498_s12 = inlined_call_operand.vmem [shape: f32[2,1,256], index: 12, kind: input, shape index: {}]   ;;  %s4499_s13 = inlined_call_operand.vmem [shape: bf16[2,256,128], index: 13, kind: input, shape index: {}]   ;;  %s4500_s14 = inlined_call_operand.vmem [shape: f32[2,1,128], index: 14, kind: input, shape index: {}]   ;;  %s4501_s15 = inlined_call_operand.vmem [shape: f32[1,128], index: 15, kind: input, shape index: {}]   ;;  %s4502_s16 = inlined_call_operand.vmem [shape: f32[1,128], index: 16, kind: input, shape index: {}]   ;;  %s4503_s17 = inlined_call_operand.vmem [shape: bf16[128,128], index: 17, kind: input, shape index: {}]   ;;  %s4504_s18 = inlined_call_operand.vmem [shape: f32[1,128], index: 18, kind: input, shape index: {}]   ;;  %s4505_s19 = inlined_call_operand.hbm [shape: f32[2,1,128], index: 19, kind: output, shape index: {}]  }
   0x1   :  { %4522 = sst [smem:[#allocation18_spill]] %s4486_s0 }
   0x2   :  { %4523 = sst [smem:[#allocation19_spill]] %s4487_s1 }
   0x3   :  { %4524 = sst [smem:[#allocation20_spill]] %s4488_s2 }
   0x4   :  { %4525 = sst [smem:[#allocation21_spill]] %s4489_s3 }
   0x5   :  { %4526 = sst [smem:[#allocation22_spill]] %s4491_s5 }
   0x6   :  { %4527 = sst [smem:[#allocation23_spill]] %s4492_s6 }
   0x7   :  { %4528 = sst [smem:[#allocation24_spill]] %s4493_s7 }
   0x8   :  { %4529 = sst [smem:[#allocation25_spill]] %s4501_s15 }
   0x9   :  { %4530 = sst [smem:[#allocation26_spill]] %s4502_s16 }
   0xa   :  { %4531 = sst [smem:[#allocation27_spill]] %s4503_s17 }
   0xb   :  { %4532 = sst [smem:[#allocation28_spill]] %s4504_s18 }
   0xc   :  { %4533 = sst [smem:[#allocation29_spill]] %s4505_s19 }
   0xd   :  { %24 = vsyncpa [#allocation4], 0 }
   0xe   :  { %26 = vsyncpa [#allocation4 + $0x1], 0  ;;  %s3679_s0 = smov 0   ;;  %s3681_s30 = smov 0  }
   0xf   :  { %s3683_s20 = smov 0   ;;  %s3685_s21 = smov 0  }
  0x10   :  { %s3687_s1 = smov 0   ;;  %s3689_s22 = smov 0  }
  0x11   :  { %s3691_s2 = smov 0   ;;  %s3693_s23 = smov 0  }
  0x12 LB: > { %4534 = sst [smem:[#allocation6_spill]] %s3543_s0  ;;  %s2837_s24 = sadd.s32 4294967295, %s3571_s23   ;;  %s3571_s23 = sphi %s3693_s23, %s32_s23   ;;  %s3567_s2 = sphi %s3691_s2, %s4582_s2   ;;  %s3563_s22 = sphi %s3689_s22, %s4581_s22   ;;  %s3559_s1 = sphi %s3687_s1, %s4580_s1   ;;  %s3555_s21 = sphi %s3685_s21, %s4579_s21   ;;  %s3551_s20 = sphi %s3683_s20, %s4578_s20   ;;  %s3547_s30 = sphi %s3681_s30, %s4584_s30   ;;  %s3543_s0 = sphi %s3679_s0, %s4583_s0  }
  0x13   : > { %4535 = sst [smem:[#allocation7_spill]] %s3551_s20  ;;  %s2838_s25 = sadd.s32 4294967294, %s3571_s23  }
  0x14   : > { %4536 = sst [smem:[#allocation8_spill]] %s3555_s21  ;;  %s41_s3 = sadd.s32 1, %s3563_s22 }
  0x15   : > { %4537 = sst [smem:[#allocation9_spill]] %s3559_s1  ;;  %p42_p0 = scmp.ge.s32.totalorder %s41_s3, 2 }
  0x16   : > { %4538 = sst [smem:[#allocation10_spill]] %s3563_s22  ;;  %s44_s26 = sadd.s32 1, %s3567_s2 }
  0x17   : > { %4539 = sst [smem:[#allocation11_spill]] %s3567_s2  ;;  %p525_p1 = scmp.ne.s32.totalorder %s3551_s20, %s3547_s30 }
  0x18   : > { %4540 = sst [smem:[#allocation12_spill]] %s3571_s23  ;;  %p526_p2 = scmp.eq.s32.totalorder %s2837_s24, 3 }
  0x19   : > { %s4586_s3 = smov (%p42_p0, %s41_s3), 0  ;;  %s4588_s26 = smov (!%p42_p0, %s44_s26), %s3567_s2 }
  0x1a   : > { %4541 = sst [smem:[#allocation13_spill]] %s4586_s3  ;;  %p3728_p3 = por %p526_p2, %p525_p1 }
  0x1b   : > { %p531_p4 = scmp.ne.s32.totalorder %s3547_s30, %s3543_s0  ;;  %p46_p5 = scmp.ge.s32.totalorder %s4588_s26, 2 }
  0x1c   : > { %s4542_s27 = scalar_select %p3728_p3, 1, 0 }
  0x1d   : > { %p532_p6 = scmp.eq.s32.totalorder %s2838_s25, 3  ;;  %p2841_p7 = scmp.ge.s32.totalorder %s3571_s23, 1 }
  0x1e   : > { %4543 = sst [smem:[#allocation14_spill]] %s4542_s27  ;;  %p658_p8 = scmp.lt.s32.totalorder %s3571_s23, 5 }
  0x1f   : > { %s4590_s26 = smov (%p46_p5, %s4588_s26), 0  ;;  %p3738_p9 = por %p532_p6, %p531_p4 }
  0x20   : > { %4544 = sst [smem:[#allocation15_spill]] %s4590_s26  ;;  %p659_p10 = pnand %p2841_p7, %p658_p8 }
  0x21   : > { %s4545_s28 = scalar_select %p3738_p9, 1, 0 }
  0x22   : > { %s512_s29 = ssub.s32 %s3567_s2, %s4590_s26  ;;  %s515_s24 = sadd.s32 1, %s3551_s20 }
  0x23   : > { %4546 = sst [smem:[#allocation16_spill]] %s4545_s28  ;;  %p513_p11 = scmp.eq.s32.totalorder %s512_s29, 0 }
  0x24   : > { %662 = sbr.rel (%p659_p10) target bundleno = 2746 (0xaba), region = 96  ;;  %p759_p12 = scmp.lt.s32.totalorder (!%p659_p10), %s3559_s1, 1 }
  0x25   : > { %s3746_s3 = scalar_select %p513_p11, %s3551_s20, %s515_s24  }
  0x26   : > { %p764_p13 = scmp.lt.s32.totalorder (!%p659_p10), %s3555_s21, 1  ;;  %s4549_s19 = sld [smem:[#allocation18_spill]] (!%p659_p10) }
  0x27   : > { %4547 = sst [smem:[#allocation17_spill]] %s3746_s3 }
  0x28   : > { %s4550_s5 = sld [smem:[#allocation22_spill]] (!%p659_p10) }
  0x29   : > { %s760_s22 = scalar_select %p759_p12, %s3559_s1, 1 }
  0x2a   : > { %s3753_s0 = scalar_select %p764_p13, %s3555_s21, 1 }
  0x2b   : > { %s3299_s29 = smul.u32 12, %s760_s22  ;;  %s4551_s7 = sld [smem:[#allocation24_spill]] }
  0x2c   : > { %s3300_s18 = smul.u32 192, %s3753_s0  ;;  %s3207_s15 = sshll.u32 %s3753_s0, 6 }
  0x2d   : > { %s3766_s1 = scalar_lea.vmem %s4549_s19, %s3299_s29  ;;  %s3301_s16 = smul.u32 3, %s3753_s0 }
  0x2e   : > { %s3774_s21 = scalar_lea.vmem %s4550_s5, %s3300_s18  ;;  %s4552_s6 = sld [smem:[#allocation23_spill]] }
  0x2f   : > { %s3208_s2 = sshll.u32 %s3753_s0, 7  ;;  %s809_s22 = scalar_lea.vmem %s4500_s14, %s3753_s0 }
  0x30   : > { %s3803_s3 = scalar_lea.vmem %s4497_s11, %s3208_s2  ;;  %s3813_s28 = scalar_lea.vmem %s4499_s13, %s3208_s2 }
  0x31   : > { %s3779_s20 = scalar_lea.vmem %s4551_s7, %s3207_s15  ;;  %s2848_s15 = sshll.u32 %s3753_s0, 1 }
  0x32   : > { %s3808_s19 = scalar_lea.vmem %s4498_s12, %s2848_s15  ;;  %s4553_s5 = sand.u32 1, %s3547_s30  }
  0x33   : > { %s3821_s17 = scalar_lea.vmem [#allocation3], %s4553_s5  ;;  %s4554_s7 = sld [smem:[#allocation8_spill]] }
  0x34   : > { %s3784_s23 = scalar_lea.vmem %s4552_s6, %s3301_s16 }
  0x39   : > { %p2851_p0 = scmp.ne.s32.totalorder %s4554_s7, 0 }
  0x3a   : > { %s4555_s16 = sld [smem:[#allocation20_spill]] (!%p2851_p0) }
  0x3b   : > { %814 = sbr.rel (%p2851_p0) target bundleno = 233 (0xe9), region = 100  ;;  %s4556_s27 = sld [smem:[#allocation19_spill]] (!%p2851_p0) }
  0x40   : > { %v3218_v0 = vld [vmem:[%s4555_s16 + $0x38] sm:$0xff]  ;;  %v3217_v1 = vld [vmem:[%s4555_s16 + $0x30] sm:$0xff]  ;;  %v3216_v2 = vld [vmem:[%s4555_s16 + $0x28] sm:$0xff] }
  0x41   : > { %895 = vmatpush.bf16.msra.mxu0 %v3218_v0  ;;  %3291 = vmatpush.bf16.msra.mxu1 %v3218_v0  ;;  %v3215_v3 = vld [vmem:[%s4555_s16 + $0x20] sm:$0xff]  ;;  %v3214_v4 = vld [vmem:[%s4555_s16 + $0x18] sm:$0xff]  ;;  %v3213_v5 = vld [vmem:[%s4555_s16 + $0x10] sm:$0xff] }
  0x42   : > { %v3212_v6 = vld [vmem:[%s4555_s16 + $0x8] sm:$0xff]  ;;  %v3211_v9 = vld [vmem:[%s4555_s16] sm:$0xff]  ;;  %v836_v13 = vld [vmem:[%s4556_s27 + $0x10] sm:$0xff] }
  0x43   : > { %v817_v7 = vld [vmem:[%s3766_s1 + $0x8] sm:$0xf]  ;;  %v3210_v10 = vld [vmem:[%s3766_s1] sm:$0xff] }
  0x44   : > { %v842_v8 = vunpack.c.l.b16 %v817_v7  ;;  %v834_v12 = vld [vmem:[%s4556_s27] sm:$0xff]  ;;  %v835_v18 = vld [vmem:[%s4556_s27 + $0x8] sm:$0xff] }
  0x45   : > { %896 = vmatpush.bf16.msra.mxu0 %v3217_v1  ;;  %3292 = vmatpush.bf16.msra.mxu1 %v3217_v1 }
  0x46   : > { %v844_v11 = vpack.c.b16 %v842_v8, %v842_v8 }
  0x49   : > { %897 = vmatpush.bf16.msra.mxu0 %v3216_v2  ;;  %3293 = vmatpush.bf16.msra.mxu1 %v3216_v2 }
  0x4d   : > { %898 = vmatpush.bf16.msra.mxu0 %v3215_v3  ;;  %3294 = vmatpush.bf16.msra.mxu1 %v3215_v3 }
  0x51   : > { %899 = vmatpush.bf16.msra.mxu0 %v3214_v4  ;;  %3295 = vmatpush.bf16.msra.mxu1 %v3214_v4 }
  0x55   : > { %900 = vmatpush.bf16.msra.mxu0 %v3213_v5  ;;  %3296 = vmatpush.bf16.msra.mxu1 %v3213_v5 }
  0x59   : > { %901 = vmatpush.bf16.msra.mxu0 %v3212_v6  ;;  %3297 = vmatpush.bf16.msra.mxu1 %v3212_v6 }
  0x5d   : > { %902 = vmatpush.bf16.msra.mxu0 %v3211_v9  ;;  %3298 = vmatpush.bf16.msra.mxu1 %v3211_v9 }
  0x60   : > { %903 = vmatmul.bf16.vlgmr.msra.gmra.mxu0 %v3210_v10  ;;  %908 = vmatmul.bf16.vlgmr.msra.gmra.mxu1 %v844_v11 }
  0xdd   : > { %v904_v14 = vpop.f32.mrf.mxu0  ;;  %v909_v15 = vpop.f32.mrf.mxu1 }
  0xde   : > { %v905_v16 = vadd.f32 %v904_v14, %v834_v12  ;;  %v910_v17 = vadd.f32 %v909_v15, %v836_v13 }
  0xe0   : > { %913 = vst [vmem:[#allocation2 + $0x10] sm:$0xff] %v905_v16 }
  0xe1   : > { %915 = vst [vmem:[#allocation2 + $0x8] sm:$0xff] %v910_v17 }
  0xe5   : > { %v906_v19 = vpop.f32.mrf.mxu0  ;;  %v911_v20 = vpop.f32.mrf.mxu1 }
  0xe6   : > { %v907_v21 = vadd.f32 %v906_v19, %v835_v18 }
  0xe8   : > { %914 = vst [vmem:[#allocation2] sm:$0xff] %v907_v21 }
  0xe9 PF: > { %v916_v22 = vld [vmem:[#allocation2 + $0x10] sm:$0xff]  ;;  %v918_v23 = vld [vmem:[#allocation2 + $0x8] sm:$0xff]  ;;  %v921_v25 = vlaneseq  ;;  %v2976_v46 = vld [vmem:[%s3774_s21 + $0xb4] sm:$0xf0]  ;;  %s4557_s26 = sld [smem:[#allocation21_spill]]  ;;  %s4559_s24 = scalar_lea.vmem %s4490_s4, %s3753_s0  ;;  %vm1249_vm10 = vcmask 130048  }
  0xea   : > { %924 = vadd.xlane.f32.xlu0 %v916_v22  ;;  %928 = vadd.xlane.f32.xlu1 %v918_v23  ;;  %v2974_v42 = vld [vmem:[%s3774_s21 + $0xa8] sm:$0xf]  ;;  %v3241_v43 = vld [vmem:[%s3774_s21 + $0xb0] sm:$0xf0]  ;;  %v3240_v44 = vld [vmem:[%s3774_s21 + $0xac] sm:$0xf]  ;;  %s4560_s7 = scalar_lea.vmem %s4494_s8, %s3753_s0 }
  0xeb   : > { %v3859_v26 = vand.u32 127, %v921_v25  ;;  %v2975_v45 = vor.u32 %v3241_v43, %v2974_v42  ;;  %v2982_v47 = vld [vmem:[%s3774_s21 + $0xb0] sm:$0xf]  ;;  %v3242_v48 = vld [vmem:[%s3774_s21 + $0xb8] sm:$0xf0]  ;;  %v2979_v49 = vor.u32 %v3240_v44, %v2976_v46  ;;  %s3574_s5 = smov 96  }
  0xec   : > { %v2983_v50 = vor.u32 %v3242_v48, %v2982_v47  ;;  %v2962_v51 = vld [vmem:[%s3774_s21 + $0x90] sm:$0xf]  ;;  %v3238_v52 = vld [vmem:[%s3774_s21 + $0x98] sm:$0xf0]  ;;  %v3237_v53 = vld [vmem:[%s3774_s21 + $0x94] sm:$0xf] }
  0xed   : > { %vm923_vm0 = vcmp.lt.s32.totalorder %v3859_v26, 64  ;;  %1169 = vmatpush.bf16.msra.mxu0 %v2975_v45  ;;  %1187 = vmatpush.bf16.msra.mxu1 %v2979_v49  ;;  %v2963_v54 = vor.u32 %v3238_v52, %v2962_v51  ;;  %v2964_v55 = vld [vmem:[%s3774_s21 + $0x9c] sm:$0xf0]  ;;  %v2970_v56 = vld [vmem:[%s3774_s21 + $0x98] sm:$0xf]  ;;  %vm1343_vm11 = vcmask 1043456  }
  0xee   : > { %1205 = vmatpush.bf16.msra.mxu2 %v2983_v50  ;;  %v3239_v57 = vld [vmem:[%s3774_s21 + $0xa0] sm:$0xf0]  ;;  %v2967_v58 = vor.u32 %v3237_v53, %v2964_v55  ;;  %v2950_v60 = vld [vmem:[%s3774_s21 + $0x78] sm:$0xf]  ;;  %v3234_v62 = vld [vmem:[%s3774_s21 + $0x7c] sm:$0xf] }
  0xef   : > { %v917_v24 = vld [vmem:[#allocation2] sm:$0xff]  ;;  %v2971_v59 = vor.u32 %v3239_v57, %v2970_v56  ;;  %v2952_v0 = vld [vmem:[%s3774_s21 + $0x84] sm:$0xf0]  ;;  %v3236_v2 = vld [vmem:[%s3774_s21 + $0x88] sm:$0xf0]  ;;  %s4558_s15 = scalar_lea.vmem %s4557_s26, %s3753_s0  ;;  %s3575_s6 = smov 80  }
  0xf0   : > { %v3235_v61 = vld [vmem:[%s3774_s21 + $0x80] sm:$0xf0]  ;;  %v2958_v1 = vld [vmem:[%s3774_s21 + $0x80] sm:$0xf]  ;;  %v2955_v3 = vor.u32 %v3234_v62, %v2952_v0  ;;  %v3232_v6 = vld [vmem:[%s3774_s21 + $0x68] sm:$0xf0] }
  0xf1   : > { %1170 = vmatpush.bf16.msra.mxu0 %v2963_v54  ;;  %1188 = vmatpush.bf16.msra.mxu1 %v2967_v58  ;;  %v2951_v63 = vor.u32 %v3235_v61, %v2950_v60  ;;  %v2959_v4 = vor.u32 %v3236_v2, %v2958_v1  ;;  %v2938_v5 = vld [vmem:[%s3774_s21 + $0x60] sm:$0xf]  ;;  %v3231_v7 = vld [vmem:[%s3774_s21 + $0x64] sm:$0xf]  ;;  %v2940_v9 = vld [vmem:[%s3774_s21 + $0x6c] sm:$0xf0] }
  0xf2   : > { %926 = vadd.xlane.f32.xlu0 %v917_v24  ;;  %1206 = vmatpush.bf16.msra.mxu2 %v2971_v59  ;;  %v2939_v8 = vor.u32 %v3232_v6, %v2938_v5  ;;  %v2946_v10 = vld [vmem:[%s3774_s21 + $0x68] sm:$0xf]  ;;  %v3233_v11 = vld [vmem:[%s3774_s21 + $0x70] sm:$0xf0]  ;;  %v2943_v12 = vor.u32 %v3231_v7, %v2940_v9  ;;  %v3228_v16 = vld [vmem:[%s3774_s21 + $0x4c] sm:$0xf] }
  0xf3   : > { %v2947_v13 = vor.u32 %v3233_v11, %v2946_v10  ;;  %v2926_v14 = vld [vmem:[%s3774_s21 + $0x48] sm:$0xf]  ;;  %v3229_v15 = vld [vmem:[%s3774_s21 + $0x50] sm:$0xf0]  ;;  %v2928_v18 = vld [vmem:[%s3774_s21 + $0x54] sm:$0xf0] }
  0xf4   : > { %v2927_v17 = vor.u32 %v3229_v15, %v2926_v14  ;;  %v2934_v19 = vld [vmem:[%s3774_s21 + $0x50] sm:$0xf]  ;;  %v3230_v20 = vld [vmem:[%s3774_s21 + $0x58] sm:$0xf0]  ;;  %v2931_v21 = vor.u32 %v3228_v16, %v2928_v18  ;;  %v3225_v25 = vld [vmem:[%s3774_s21 + $0x34] sm:$0xf] }
  0xf5   : > { %1171 = vmatpush.bf16.msra.mxu0 %v2951_v63  ;;  %1189 = vmatpush.bf16.msra.mxu1 %v2955_v3  ;;  %v3224_v42 = vld [vmem:[%s3774_s21 + $0x28] sm:$0xf0]  ;;  %v2890_v47 = vld [vmem:[%s3774_s21] sm:$0xf]  ;;  %v3219_v50 = vld [vmem:[%s3774_s21 + $0x4] sm:$0xf] }
  0xf6   : > { %1207 = vmatpush.bf16.msra.mxu2 %v2959_v4  ;;  %v3220_v48 = vld [vmem:[%s3774_s21 + $0x8] sm:$0xf0]  ;;  %v2892_v51 = vld [vmem:[%s3774_s21 + $0xc] sm:$0xf0]  ;;  %v2898_v52 = vld [vmem:[%s3774_s21 + $0x8] sm:$0xf] }
  0xf7   : > { %v2891_v49 = vor.u32 %v3220_v48, %v2890_v47  ;;  %v2895_v54 = vor.u32 %v3219_v50, %v2892_v51  ;;  %v3221_v55 = vld [vmem:[%s3774_s21 + $0x10] sm:$0xf0]  ;;  %vm1223_vm12 = vcmp.lt.s32.totalorder %v3859_v26, 17  ;;  %vm1283_vm13 = vcmask 195584   ;;  %s3576_s25 = smov 16   ;;  %s3577_s1 = smov 32  }
  0xf8   : > { %v2899_v56 = vor.u32 %v3221_v55, %v2898_v52  ;;  %s3578_s18 = smov 48   ;;  %vm1755_vm14 = vcmask 261120   ;;  %vm1759_vm15 = vcmask 392192  }
  0xf9   : > { %1172 = vmatpush.bf16.msra.mxu0 %v2939_v8  ;;  %1190 = vmatpush.bf16.msra.mxu1 %v2943_v12 }
  0xfa   : > { %1208 = vmatpush.bf16.msra.mxu2 %v2947_v13  ;;  %v3394_v13 = vld [vmem:[%s4558_s15] ss:$0 sm:$0xff]  ;;  %s4561_s15 = scalar_lea.vmem %s4495_s9, %s3753_s0 }
  0xfd   : > { %1173 = vmatpush.bf16.msra.mxu0 %v2927_v17  ;;  %1191 = vmatpush.bf16.msra.mxu1 %v2931_v21 }
 0x15d   : > { %v925_v27 = vpop.xlane.xlu0 %924  ;;  %v929_v32 = vpop.xlane.xlu1 %928 }
 0x15e   : > { %v930_v28 = vmul.f32 0.015625, %v925_v27  ;;  %v932_v35 = vmul.f32 0.015625, %v929_v32 }
 0x160   : > { %v933_v29 = vsub.f32 %v916_v22, %v930_v28  ;;  %v935_v37 = vsub.f32 %v918_v23, %v932_v35  ;;  %v2935_v22 = vor.u32 %v3230_v20, %v2934_v19  ;;  %v2914_v23 = vld [vmem:[%s3774_s21 + $0x30] sm:$0xf]  ;;  %v2916_v28 = vld [vmem:[%s3774_s21 + $0x3c] sm:$0xf0]  ;;  %v3223_v35 = vld [vmem:[%s3774_s21 + $0x20] sm:$0xf0] }
 0x161   : > { %v2919_v32 = vor.u32 %v3225_v25, %v2916_v28  ;;  %v3395_v20 = vld [vmem:[%s4559_s24] ss:$0 sm:$0xff]  ;;  %s4562_s24 = scalar_lea.vmem %s4496_s10, %s3753_s0  ;;  %s4565_s0 = sld [smem:[#allocation8_spill]] }
 0x162   : > { %v3864_v30 = vsel %vm923_vm0, %v933_v29, 0.0  ;;  %v3876_v40 = vsel %vm923_vm0, %v935_v37, 0.0  ;;  %1209 = vmatpush.bf16.msra.mxu2 %v2935_v22  ;;  %v2922_v29 = vld [vmem:[%s3774_s21 + $0x38] sm:$0xf] }
 0x163   : > { %v939_v31 = vmul.f32 %v3864_v30, %v3864_v30  ;;  %v941_v41 = vmul.f32 %v3876_v40, %v3876_v40  ;;  %1192 = vmatpush.bf16.msra.mxu1 %v2919_v32 }
 0x165   : > { %942 = vadd.xlane.f32.xlu1 %v939_v31  ;;  %v927_v33 = vpop.xlane.xlu0 %926  ;;  %v3227_v31 = vld [vmem:[%s3774_s21 + $0x40] sm:$0xf0] }
 0x166   : > { %v931_v34 = vmul.f32 0.015625, %v927_v33  ;;  %v2923_v33 = vor.u32 %v3227_v31, %v2922_v29 }
 0x167   : > { %p3172_p1 = scmp.ne.s32.totalorder %s4565_s0, 1 }
 0x168   : > { %v934_v36 = vsub.f32 %v917_v24, %v931_v34  ;;  %v3226_v24 = vld [vmem:[%s3774_s21 + $0x38] sm:$0xf0]  ;;  %1210 = vmatpush.bf16.msra.mxu2 %v2923_v33  ;;  %v2902_v34 = vld [vmem:[%s3774_s21 + $0x18] sm:$0xf]  ;;  %v1033_v33 = vld [vmem:[%s3784_s23] sm:$0x7] }
 0x169   : > { %v2915_v27 = vor.u32 %v3226_v24, %v2914_v23  ;;  %v2903_v37 = vor.u32 %v3223_v35, %v2902_v34  ;;  %s3573_s23 = smov 112  }
 0x16a   : > { %v3870_v38 = vsel %vm923_vm0, %v934_v36, 0.0  ;;  %v3222_v36 = vld [vmem:[%s3774_s21 + $0x1c] sm:$0xf] }
 0x16b   : > { %v940_v39 = vmul.f32 %v3870_v38, %v3870_v38  ;;  %1174 = vmatpush.bf16.msra.mxu0 %v2915_v27 }
 0x16d   : > { %944 = vadd.xlane.f32.xlu2 %v940_v39  ;;  %v2904_v39 = vld [vmem:[%s3774_s21 + $0x24] sm:$0xf0] }
 0x16e   : > { %v2907_v43 = vor.u32 %v3222_v36, %v2904_v39  ;;  %v1035_v36 = vperm.slane %v1033_v33, 0 }
 0x16f   : > { %1175 = vmatpush.bf16.msra.mxu0 %v2903_v37  ;;  %v1036_v37 = vperm.slane %v1033_v33, 1 }
 0x170   : > { %1193 = vmatpush.bf16.msra.mxu1 %v2907_v43 }
 0x173   : > { %1176 = vmatpush.bf16.msra.mxu0 %v2891_v49 }
 0x174   : > { %1194 = vmatpush.bf16.msra.mxu1 %v2895_v54 }
 0x175   : > { %946 = vadd.xlane.f32.xlu2 %v941_v41  ;;  %v2910_v41 = vld [vmem:[%s3774_s21 + $0x20] sm:$0xf] }
 0x176   : > { %v2911_v44 = vor.u32 %v3224_v42, %v2910_v41 }
 0x178   : > { %1211 = vmatpush.bf16.msra.mxu2 %v2911_v44 }
 0x17c   : > { %1212 = vmatpush.bf16.msra.mxu2 %v2899_v56 }
 0x1d8   : > { %v943_v45 = vpop.xlane.xlu1 %942 }
 0x1d9   : > { %v948_v46 = vmul.f32 0.015625, %v943_v45 }
 0x1db   : > { %v951_v53 = vadd.f32 1e-05, %v948_v46 }
 0x1dd   : > { %3400 = vrsqrt.f32 %v951_v53  ;;  %vm960_vm2 = vweird.f32 %v951_v53 }
 0x1e0   : > { %v945_v57 = vpop.xlane.xlu2 %944 }
 0x1e1   : > { %v949_v58 = vmul.f32 0.015625, %v945_v57 }
 0x1e3   : > { %v3401_v59 = vpop.eup %3400  ;;  %v952_v60 = vadd.f32 1e-05, %v949_v58 }
 0x1e4   : > { %v955_v61 = vmul.f32 %v3401_v59, %v951_v53  ;;  %vm961_vm1 = vweird.f32 %v3401_v59 }
 0x1e5   : > { %3402 = vrsqrt.f32 %v952_v60  ;;  %vm962_vm3 = vmor %vm960_vm2, %vm961_vm1  ;;  %vm970_vm5 = vweird.f32 %v952_v60  ;;  %vm1763_vm1 = vcmask 523264  }
 0x1e6   : > { %v956_v62 = vmul.f32 %v3401_v59, %v955_v61  ;;  %vm3032_vm2 = vmpackc.low %vm1763_vm1, %vm1763_vm1 }
 0x1e8   : > { %v957_v63 = vmul.f32 0.5, %v956_v62  ;;  %v947_v0 = vpop.xlane.xlu2 %946 }
 0x1e9   : > { %v950_v1 = vmul.f32 0.015625, %v947_v0 }
 0x1ea   : > { %v958_v2 = vsub.f32 1.5, %v957_v63 }
 0x1eb   : > { %v3403_v3 = vpop.eup %3402  ;;  %v953_v4 = vadd.f32 1e-05, %v950_v1  ;;  %v1037_v1 = vperm.slane %v1033_v33, 2 }
 0x1ec   : > { %v959_v5 = vmul.f32 %v3401_v59, %v958_v2  ;;  %v965_v6 = vmul.f32 %v3403_v3, %v952_v60  ;;  %vm971_vm4 = vweird.f32 %v3403_v3 }
 0x1ed   : > { %3404 = vrsqrt.f32 %v953_v4  ;;  %vm972_vm6 = vmor %vm970_vm5, %vm971_vm4  ;;  %vm980_vm7 = vweird.f32 %v953_v4 }
 0x1ee   : > { %v966_v7 = vmul.f32 %v3403_v3, %v965_v6  ;;  %v963_v8 = vsel %vm962_vm3, %v3401_v59, %v959_v5 }
 0x1ef   : > { %v984_v12 = vmul.f32 %v963_v8, %v3864_v30 }
 0x1f0   : > { %v967_v9 = vmul.f32 0.5, %v966_v7 }
 0x1f1   : > { %v990_v19 = vmul.f32 %v3394_v13, %v984_v12 }
 0x1f2   : > { %v968_v10 = vsub.f32 1.5, %v967_v9 }
 0x1f3   : > { %v3405_v11 = vpop.eup %3404  ;;  %v996_v23 = vadd.f32 %v3395_v20, %v990_v19 }
 0x1f4   : > { %v969_v14 = vmul.f32 %v3403_v3, %v968_v10  ;;  %v975_v15 = vmul.f32 %v3405_v11, %v953_v4  ;;  %vm981_vm8 = vweird.f32 %v3405_v11 }
 0x1f5   : > { %vm982_vm9 = vmor %vm980_vm7, %vm981_vm8 }
 0x1f6   : > { %v973_v16 = vsel %vm972_vm6, %v3403_v3, %v969_v14  ;;  %v976_v17 = vmul.f32 %v3405_v11, %v975_v15 }
 0x1f7   : > { %v985_v18 = vmul.f32 %v973_v16, %v3870_v38 }
 0x1f8   : > { %v977_v30 = vmul.f32 0.5, %v976_v17 }
 0x1f9   : > { %v991_v21 = vmul.f32 %v3394_v13, %v985_v18 }
 0x1fa   : > { %v978_v22 = vsub.f32 1.5, %v977_v30 }
 0x1fb   : > { %v997_v24 = vadd.f32 %v3395_v20, %v991_v21 }
 0x1fc   : > { %v979_v25 = vmul.f32 %v3405_v11, %v978_v22 }
 0x1fd   : > { %v999_v27 = vpack.c.bf16 %v997_v24, %v996_v23 }
 0x1fe   : > { %v983_v28 = vsel %vm982_vm9, %v3405_v11, %v979_v25 }
 0x1ff   : > { %1177 = vmatmul.bf16.vlgmr.msra.gmra.mxu0 %v999_v27  ;;  %1195 = vmatmul.bf16.vlgmr.msra.gmra.mxu1 %v999_v27  ;;  %v986_v38 = vmul.f32 %v983_v28, %v3876_v40 }
 0x200   : > { %1213 = vmatmul.bf16.vlgmr.msra.gmra.mxu2 %v999_v27 }
 0x201   : > { %v992_v29 = vmul.f32 %v3394_v13, %v986_v38 }
 0x203   : > { %v998_v31 = vadd.f32 %v3395_v20, %v992_v29 }
 0x205   : > { %v1000_v32 = vpack.c.bf16 %v998_v31, %v998_v31 }
 0x20f   : > { %1182 = vmatmul.bf16.gmra.mxu0 %v1000_v32  ;;  %1200 = vmatmul.bf16.gmra.mxu1 %v1000_v32 }
 0x210   : > { %1218 = vmatmul.bf16.gmra.mxu2 %v1000_v32 }
 0x27c   : > { %v1178_v34 = vpop.f32.mrf.mxu0  ;;  %v1196_v35 = vpop.f32.mrf.mxu1 }
 0x27d   : > { %v1179_v39 = vadd.f32 %v1178_v34, %v1035_v36  ;;  %v1197_v41 = vadd.f32 %v1196_v35, %v1036_v37 }
 0x27f   : > { %v1224_v45 = vpack.c.bf16 %v1179_v39, %v1179_v39  ;;  %v1227_v46 = vpack.c.bf16 %v1197_v41, %v1197_v41 }
 0x281   : > { %v1236_v50 = vunpack.c.l.b16 %v1224_v45  ;;  %v1244_v51 = vunpack.c.l.b16 %v1227_v46 }
 0x283   : > { %v1214_v42 = vpop.f32.mrf.mxu2 }
 0x284   : > { %v1180_v43 = vpop.f32.mrf.mxu0  ;;  %v1198_v44 = vpop.f32.mrf.mxu1  ;;  %v1215_v11 = vadd.f32 %v1214_v42, %v1037_v1 }
 0x285   : > { %v1181_v47 = vadd.f32 %v1180_v43, %v1035_v36  ;;  %v1199_v40 = vadd.f32 %v1198_v44, %v1036_v37 }
 0x286   : > { %v1230_v15 = vpack.c.bf16 %v1215_v11, %v1215_v11 }
 0x287   : > { %v1225_v48 = vpack.c.bf16 %v1181_v47, %v1181_v47  ;;  %v1228_v49 = vpack.c.bf16 %v1199_v40, %v1199_v40 }
 0x288   : > { %v1331_v20 = vunpack.c.l.b16 %v1230_v15 }
 0x289   : > { %v1237_v52 = vunpack.c.l.b16 %v1225_v48  ;;  %v1245_v53 = vunpack.c.l.b16 %v1228_v49 }
 0x28b   : > { %v1239_v54 = vpack.c.b16 %v1237_v52, %v1236_v50  ;;  %v1247_v55 = vpack.c.b16 %v1245_v53, %v1244_v51  ;;  %v1216_v56 = vpop.f32.mrf.mxu2 }
 0x28c   : > { %v1183_v57 = vpop.f32.mrf.mxu0  ;;  %v1201_v58 = vpop.f32.mrf.mxu1  ;;  %v1217_v8 = vadd.f32 %v1216_v56, %v1037_v1 }
 0x28d   : > { %v1184_v59 = vadd.f32 %v1183_v57, %v1035_v36  ;;  %v1202_v60 = vadd.f32 %v1201_v58, %v1036_v37  ;;  %1369 = vrot.lane.b32.xlu1 %v1247_v55, %s3573_s23  ;;  %1365 = vrot.lane.b32.xlu2 %v1239_v54, %s3573_s23  ;;  %v1257_v18 = vsel %vm1249_vm10, %v1247_v55, 0 }
 0x28e   : > { %v1231_v13 = vpack.c.bf16 %v1217_v8, %v1217_v8 }
 0x28f   : > { %v1226_v61 = vpack.c.bf16 %v1184_v59, %v1184_v59  ;;  %v1229_v62 = vpack.c.bf16 %v1202_v60, %v1202_v60 }
 0x290   : > { %v1332_v17 = vunpack.c.l.b16 %v1231_v13 }
 0x291   : > { %v1238_v63 = vunpack.c.l.b16 %v1226_v61  ;;  %v1246_v0 = vunpack.c.l.b16 %v1229_v62 }
 0x292   : > { %v3956_v30 = vpack.c.b16 %v1332_v17, %v1331_v20 }
 0x293   : > { %v1240_v2 = vpack.c.b16 %v1238_v63, %v1238_v63  ;;  %v1248_v3 = vpack.c.b16 %v1246_v0, %v1246_v0  ;;  %v1219_v4 = vpop.f32.mrf.mxu2 }
 0x294   : > { %v1220_v5 = vadd.f32 %v1219_v4, %v1037_v1  ;;  %v1185_v6 = vpop.f32.mrf.mxu0  ;;  %v1203_v7 = vpop.f32.mrf.mxu1 }
 0x295   : > { %1486 = vrot.lane.b32.xlu2 %v1247_v55, %s3574_s5  ;;  %1371 = vrot.lane.b32.xlu0 %v1248_v3, %s3573_s23  ;;  %v1260_v9 = vsel %vm1249_vm10, %v1248_v3, 0 }
 0x296   : > { %v1232_v10 = vpack.c.bf16 %v1220_v5, %v1220_v5  ;;  %1367 = vrot.lane.b32.xlu1 %v1240_v2, %s3573_s23  ;;  %1268 = vmatpush.bf16.xpose.msra.mxu3 %v1260_v9 }
 0x298   : > { %v1333_v12 = vunpack.c.l.b16 %v1232_v10 }
 0x29a   : > { %v3948_v14 = vpack.c.b16 %v1333_v12, %v1333_v12 }
 0x29b   : > { %v1221_v16 = vpop.f32.mrf.mxu2 }
 0x29c   : > { %v1345_v19 = vsel %vm1343_vm11, %v3948_v14, 0 }
 0x29d   : > { %1482 = vrot.lane.b32.xlu2 %v1239_v54, %s3574_s5  ;;  %1488 = vrot.lane.b32.xlu0 %v1248_v3, %s3574_s5 }
 0x29e   : > { %1603 = vrot.lane.b32.xlu1 %v1247_v55, %s3575_s6  ;;  %1269 = vmatpush.bf16.xpose.msra.mxu3 %v1257_v18 }
 0x2a5   : > { %1605 = vrot.lane.b32.xlu0 %v1248_v3, %s3575_s6  ;;  %2984 = vmatmul.msk.bf16.vlgmr.msra.gmra.mxu3 %vm1249_vm10, %v1239_v54 }
 0x2a6   : > { %1353 = vmatpush.bf16.msrb.mxu3 %v1345_v19  ;;  %1484 = vrot.lane.b32.xlu2 %v1240_v2, %s3574_s5 }
 0x2a7   : > { %1601 = vrot.lane.b32.xlu1 %v1240_v2, %s3575_s6 }
 0x2aa   : > { %1354 = vmatpush.bf16.msrb.mxu3 %v3956_v30 }
 0x2ad   : > { %1599 = vrot.lane.b32.xlu0 %v1239_v54, %s3575_s6 }
 0x2b5   : > { %2985 = vmatmul.msk.bf16.gmra.mxu3 %vm1249_vm10, %v1240_v2 }
 0x2e7   : > { %v1366_v24 = vpop.permute.xlu2 %1365 }
 0x2ef   : > { %v1487_v29 = vpop.permute.xlu2 %1486 }
 0x2f0   : > { %v1497_v33 = vsel %vm1249_vm10, %v1487_v29, 0 }
 0x2f7   : > { %v1483_v35 = vpop.permute.xlu2 %1482 }
 0x2ff   : > { %v1370_v23 = vpop.permute.xlu1 %1369 }
 0x300   : > { %v1380_v27 = vsel %vm1249_vm10, %v1370_v23, 0  ;;  %v1485_v42 = vpop.permute.xlu2 %1484 }
 0x307   : > { %v1372_v21 = vpop.permute.xlu0 %1371 }
 0x308   : > { %v1383_v22 = vsel %vm1249_vm10, %v1372_v21, 0  ;;  %v1368_v38 = vpop.permute.xlu1 %1367 }
 0x309   : > { %1391 = vmatpush.bf16.xpose.msrb.mxu0 %v1383_v22 }
 0x30f   : > { %v1489_v25 = vpop.permute.xlu0 %1488 }
 0x310   : > { %v1500_v28 = vsel %vm1249_vm10, %v1489_v25, 0  ;;  %v1604_v34 = vpop.permute.xlu1 %1603 }
 0x311   : > { %1392 = vmatpush.bf16.xpose.msrb.mxu0 %v1380_v27  ;;  %1508 = vmatpush.bf16.xpose.msrb.mxu2 %v1500_v28  ;;  %v1614_v36 = vsel %vm1249_vm10, %v1604_v34, 0 }
 0x317   : > { %v1606_v31 = vpop.permute.xlu0 %1605 }
 0x318   : > { %v1617_v32 = vsel %vm1249_vm10, %v1606_v31, 0  ;;  %2988 = vmatmul.msk.bf16.vlgmr.msrb.gmra.mxu0 %vm1249_vm10, %v1366_v24 }
 0x319   : > { %1509 = vmatpush.bf16.xpose.msrb.mxu2 %v1497_v33  ;;  %1625 = vmatpush.bf16.xpose.msra.mxu0 %v1617_v32  ;;  %v1602_v50 = vpop.permute.xlu1 %1601 }
 0x31f   : > { %v1600_v46 = vpop.permute.xlu0 %1599 }
 0x320   : > { %2992 = vmatmul.msk.bf16.vlgmr.msrb.gmra.mxu2 %vm1249_vm10, %v1483_v35 }
 0x321   : > { %1626 = vmatpush.bf16.xpose.msra.mxu0 %v1614_v36 }
 0x328   : > { %v1271_v37 = vpop.f32.mrf.mxu3  ;;  %2989 = vmatmul.msk.bf16.gmra.mxu0 %vm1249_vm10, %v1368_v38 }
 0x329   : > { %v1280_v39 = vsel %vm1223_vm12, %v1271_v37, -1e+30 }
 0x32a   : > { %v1284_v41 = vsel %vm1283_vm13, %v1280_v39, -inf }
 0x32b   : > { %1285 = vmax.xlane.f32.xlu0 %v1284_v41 }
 0x330   : > { %v1273_v43 = vpop.f32.mrf.mxu3  ;;  %2993 = vmatmul.msk.bf16.gmra.mxu2 %vm1249_vm10, %v1485_v42 }
 0x331   : > { %v1281_v44 = vsel %vm1223_vm12, %v1273_v43, -1e+30 }
 0x332   : > { %v1287_v45 = vsel %vm1283_vm13, %v1281_v44, -inf }
 0x333   : > { %1288 = vmax.xlane.f32.xlu2 %v1287_v45 }
 0x338   : > { %v1276_v47 = vpop.f32.mrf.mxu3  ;;  %2996 = vmatmul.msk.bf16.vlgmr.msra.gmra.mxu0 %vm1249_vm10, %v1600_v46 }
 0x339   : > { %v1282_v40 = vsel %vm1223_vm12, %v1276_v47, -1e+30 }
 0x33a   : > { %v1290_v48 = vsel %vm1283_vm13, %v1282_v40, -inf }
 0x33b   : > { %1291 = vmax.xlane.f32.xlu2 %v1290_v48 }
 0x340   : > { %v1278_v49 = vpop.f32.mrf.mxu3 }
 0x348   : > { %2997 = vmatmul.msk.bf16.gmra.mxu0 %vm1249_vm10, %v1602_v50 }
 0x395   : > { %v1394_v51 = vpop.f32.mrf.mxu0 }
 0x396   : > { %v3989_v52 = vsel %vm1223_vm12, %v1394_v51, -1e+30 }
 0x397   : > { %v1406_v53 = vsel %vm1283_vm13, %v3989_v52, -inf }
 0x398   : > { %1407 = vmax.xlane.f32.xlu1 %v1406_v53 }
 0x39d   : > { %v1396_v54 = vpop.f32.mrf.mxu0 }
 0x39e   : > { %v1286_v55 = vpop.xlane.xlu0 %1285  ;;  %v4007_v3 = vsel %vm1223_vm12, %v1396_v54, -1e+30 }
 0x39f   : > { %v1293_v57 = vsub.f32 %v1280_v39, %v1286_v55  ;;  %v1409_v7 = vsel %vm1283_vm13, %v4007_v3, -inf }
 0x3a1   : > { %v1296_v1 = vmul.f32 1.442695, %v1293_v57 }
 0x3a3   : > { %v1511_v56 = vpop.f32.mrf.mxu2 }
 0x3a4   : > { %v3995_v58 = vsel %vm1223_vm12, %v1511_v56, -1e+30 }
 0x3a5   : > { %v1399_v59 = vpop.f32.mrf.mxu0  ;;  %v1523_v60 = vsel %vm1283_vm13, %v3995_v58, -inf }
 0x3a6   : > { %v4001_v61 = vsel %vm1223_vm12, %v1399_v59, -1e+30  ;;  %1524 = vmax.xlane.f32.xlu0 %v1523_v60  ;;  %v1289_v62 = vpop.xlane.xlu2 %1288 }
 0x3a7   : > { %v1294_v63 = vsub.f32 %v1281_v44, %v1289_v62  ;;  %v1412_v0 = vsel %vm1283_vm13, %v4001_v61, -inf }
 0x3a8   : > { %1413 = vmax.xlane.f32.xlu1 %v1412_v0 }
 0x3a9   : > { %v1298_v2 = vmul.f32 1.442695, %v1294_v63 }
 0x3ab   : > { %3406 = vpow2.f32 %v1298_v2  ;;  %v1513_v4 = vpop.f32.mrf.mxu2 }
 0x3ac   : > { %3408 = vpow2.f32 %v1296_v1  ;;  %v4011_v5 = vsel %vm1223_vm12, %v1513_v4, -1e+30 }
 0x3ad   : > { %v1401_v6 = vpop.f32.mrf.mxu0  ;;  %v1526_v8 = vsel %vm1283_vm13, %v4011_v5, -inf }
 0x3ae   : > { %1410 = vmax.xlane.f32.xlu0 %v1409_v7  ;;  %1527 = vmax.xlane.f32.xlu2 %v1526_v8  ;;  %v1292_v24 = vpop.xlane.xlu2 %1291 }
 0x3af   : > { %v1295_v25 = vsub.f32 %v1282_v40, %v1292_v24 }
 0x3b1   : > { %v4017_v9 = vpop.eup %3406  ;;  %v1300_v27 = vmul.f32 1.442695, %v1295_v25 }
 0x3b2   : > { %v4019_v10 = vpop.eup %3408  ;;  %v1305_v11 = vsel %vm1283_vm13, %v4017_v9, 0.0 }
 0x3b3   : > { %v1516_v12 = vpop.f32.mrf.mxu2  ;;  %1306 = vadd.xlane.f32.xlu1 %v1305_v11  ;;  %v1302_v16 = vsel %vm1283_vm13, %v4019_v10, 0.0  ;;  %3410 = vpow2.f32 %v1300_v27 }
 0x3b4   : > { %v4025_v13 = vsel %vm1223_vm12, %v1516_v12, -1e+30 }
 0x3b5   : > { %v1628_v15 = vpop.f32.mrf.mxu0  ;;  %v1529_v17 = vsel %vm1283_vm13, %v4025_v13, -inf }
 0x3b6   : > { %1303 = vadd.xlane.f32.xlu2 %v1302_v16  ;;  %1530 = vmax.xlane.f32.xlu0 %v1529_v17  ;;  %v4033_v18 = vsel %vm1223_vm12, %v1628_v15, -1e+30 }
 0x3b7   : > { %v1640_v19 = vsel %vm1283_vm13, %v4033_v18, -inf }
 0x3b9   : > { %v4043_v28 = vpop.eup %3410 }
 0x3ba   : > { %v1308_v38 = vsel %vm1283_vm13, %v4043_v28, 0.0 }
 0x3bb   : > { %v1518_v20 = vpop.f32.mrf.mxu2  ;;  %1641 = vmax.xlane.f32.xlu1 %v1640_v19 }
 0x3bd   : > { %v1630_v21 = vpop.f32.mrf.mxu0 }
 0x3be   : > { %v4049_v29 = vsel %vm1223_vm12, %v1630_v21, -1e+30 }
 0x3bf   : > { %v1643_v32 = vsel %vm1283_vm13, %v4049_v29, -inf }
 0x3c5   : > { %v1633_v22 = vpop.f32.mrf.mxu0 }
 0x3c6   : > { %v4053_v31 = vsel %vm1223_vm12, %v1633_v22, -1e+30 }
 0x3c7   : > { %v1646_v33 = vsel %vm1283_vm13, %v4053_v31, -inf }
 0x3ca   : > { %1569 = vrot.lane.b32.xlu0 %v3948_v14, %s3574_s5 }
 0x3cd   : > { %v1635_v23 = vpop.f32.mrf.mxu0 }
 0x3ce   : > { %1450 = vrot.lane.b32.xlu2 %v3956_v30, %s3573_s23 }
 0x3d4   : > { %1452 = vrot.lane.b32.xlu1 %v3948_v14, %s3573_s23 }
 0x3f4   : > { %1309 = vadd.xlane.f32.xlu0 %v1308_v38 }
 0x3fc   : > { %1644 = vmax.xlane.f32.xlu0 %v1643_v32 }
 0x3fe   : > { %1647 = vmax.xlane.f32.xlu1 %v1646_v33 }
 0x40b   : > { %v1408_v34 = vpop.xlane.xlu1 %1407 }
 0x40c   : > { %v1415_v35 = vsub.f32 %v3989_v52, %v1408_v34 }
 0x40e   : > { %v1418_v36 = vmul.f32 1.442695, %v1415_v35 }
 0x410   : > { %3412 = vpow2.f32 %v1418_v36 }
 0x416   : > { %v4060_v37 = vpop.eup %3412 }
 0x417   : > { %1567 = vrot.lane.b32.xlu1 %v3956_v30, %s3574_s5  ;;  %v1424_v39 = vsel %vm1283_vm13, %v4060_v37, 0.0  ;;  %s4566_s5 = sld [smem:[#allocation27_spill]] (!%p3172_p1) }
 0x418   : > { %1425 = vadd.xlane.f32.xlu0 %v1424_v39 }
 0x419   : > { %v1525_v41 = vpop.xlane.xlu0 %1524 }
 0x41a   : > { %v1532_v42 = vsub.f32 %v3995_v58, %v1525_v41 }
 0x41b   : > { %v1414_v43 = vpop.xlane.xlu1 %1413 }
 0x41c   : > { %v1535_v44 = vmul.f32 1.442695, %v1532_v42  ;;  %v1417_v45 = vsub.f32 %v4001_v61, %v1414_v43 }
 0x41e   : > { %3414 = vpow2.f32 %v1535_v44  ;;  %v1422_v46 = vmul.f32 1.442695, %v1417_v45 }
 0x420   : > { %3416 = vpow2.f32 %v1422_v46 }
 0x421   : > { %v1411_v47 = vpop.xlane.xlu0 %1410  ;;  %v1528_v40 = vpop.xlane.xlu2 %1527 }
 0x422   : > { %v1416_v48 = vsub.f32 %v4007_v3, %v1411_v47  ;;  %v1533_v51 = vsub.f32 %v4011_v5, %v1528_v40 }
 0x424   : > { %v4069_v49 = vpop.eup %3414  ;;  %v1420_v50 = vmul.f32 1.442695, %v1416_v48  ;;  %v1537_v54 = vmul.f32 1.442695, %v1533_v51 }
 0x425   : > { %v1541_v52 = vsel %vm1283_vm13, %v4069_v49, 0.0 }
 0x426   : > { %3418 = vpow2.f32 %v1420_v50  ;;  %v1307_v53 = vpop.xlane.xlu1 %1306  ;;  %1542 = vadd.xlane.f32.xlu0 %v1541_v52  ;;  %v4074_v56 = vpop.eup %3416 }
 0x427   : > { %3420 = vrcp.f32 %v1307_v53  ;;  %v1430_v59 = vsel %vm1283_vm13, %v4074_v56, 0.0 }
 0x429   : > { %v1304_v55 = vpop.xlane.xlu2 %1303  ;;  %v1531_v6 = vpop.xlane.xlu0 %1530 }
 0x42a   : > { %3422 = vrcp.f32 %v1304_v55  ;;  %v1534_v45 = vsub.f32 %v4025_v13, %v1531_v6 }
 0x42b   : > { %3424 = vpow2.f32 %v1537_v54 }
 0x42c   : > { %v4076_v57 = vpop.eup %3418 }
 0x42d   : > { %v1427_v58 = vsel %vm1283_vm13, %v4076_v57, 0.0  ;;  %v3421_v60 = vpop.eup %3420 }
 0x42e   : > { %1428 = vadd.xlane.f32.xlu2 %v1427_v58  ;;  %v1642_v61 = vpop.xlane.xlu1 %1641  ;;  %1431 = vadd.xlane.f32.xlu0 %v1430_v59  ;;  %v1315_v62 = vmul.f32 %v3421_v60, %v4017_v9 }
 0x42f   : > { %v1649_v63 = vsub.f32 %v4033_v18, %v1642_v61 }
 0x430   : > { %v3423_v0 = vpop.eup %3422  ;;  %v1318_v1 = vpack.c.bf16 %v1315_v62, %v1315_v62 }
 0x431   : > { %v1314_v2 = vmul.f32 %v3423_v0, %v4019_v10  ;;  %v1652_v3 = vmul.f32 1.442695, %v1649_v63  ;;  %v4085_v4 = vpop.eup %3424  ;;  %v1451_v19 = vpop.permute.xlu2 %1450 }
 0x432   : > { %v1324_v7 = vunpack.c.l.b16 %v1318_v1  ;;  %v1544_v11 = vsel %vm1283_vm13, %v4085_v4, 0.0 }
 0x433   : > { %v1317_v5 = vpack.c.bf16 %v1314_v2, %v1314_v2  ;;  %3426 = vpow2.f32 %v1652_v3 }
 0x435   : > { %v1323_v8 = vunpack.c.l.b16 %v1317_v5 }
 0x436   : > { %1545 = vadd.xlane.f32.xlu2 %v1544_v11 }
 0x437   : > { %v1326_v12 = vpack.c.b16 %v1324_v7, %v1323_v8 }
 0x439   : > { %v4089_v9 = vpop.eup %3426  ;;  %2986 = vmatmul.msk.bf16.vlgmr.msrb.gmra.mxu3 %vm1283_vm13, %v1326_v12 }
 0x43a   : > { %v1658_v10 = vsel %vm1283_vm13, %v4089_v9, 0.0 }
 0x43b   : > { %1659 = vadd.xlane.f32.xlu0 %v1658_v10 }
 0x43c   : > { %v1570_v15 = vpop.permute.xlu0 %1569 }
 0x43d   : > { %v1579_v16 = vsel %vm1343_vm11, %v1570_v15, 0 }
 0x43e   : > { %1587 = vmatpush.bf16.msra.mxu3 %v1579_v16 }
 0x446   : > { %v1453_v17 = vpop.permute.xlu1 %1452 }
 0x447   : > { %v1462_v18 = vsel %vm1343_vm11, %v1453_v17, 0 }
 0x448   : > { %1470 = vmatpush.bf16.msrb.mxu1 %v1462_v18 }
 0x44c   : > { %1471 = vmatpush.bf16.msrb.mxu1 %v1451_v19 }
 0x44e   : > { %1684 = vrot.lane.b32.xlu2 %v3956_v30, %s3575_s6 }
 0x467   : > { %v1310_v20 = vpop.xlane.xlu0 %1309 }
 0x468   : > { %3428 = vrcp.f32 %v1310_v20 }
 0x46e   : > { %v3429_v21 = vpop.eup %3428 }
 0x46f   : > { %v1645_v22 = vpop.xlane.xlu0 %1644  ;;  %v1316_v23 = vmul.f32 %v3429_v21, %v4043_v28 }
 0x470   : > { %v1650_v24 = vsub.f32 %v4049_v29, %v1645_v22 }
 0x471   : > { %v1648_v25 = vpop.xlane.xlu1 %1647  ;;  %v1319_v27 = vpack.c.bf16 %v1316_v23, %v1316_v23 }
 0x472   : > { %v1654_v38 = vmul.f32 1.442695, %v1650_v24  ;;  %v1651_v32 = vsub.f32 %v4053_v31, %v1648_v25 }
 0x473   : > { %v1325_v33 = vunpack.c.l.b16 %v1319_v27 }
 0x474   : > { %3430 = vpow2.f32 %v1654_v38  ;;  %v1656_v34 = vmul.f32 1.442695, %v1651_v32 }
 0x475   : > { %v1327_v35 = vpack.c.b16 %v1325_v33, %v1325_v33 }
 0x476   : > { %3432 = vpow2.f32 %v1656_v34 }
 0x477   : > { %2987 = vmatmul.msk.bf16.gmra.mxu3 %vm1283_vm13, %v1327_v35 }
 0x47a   : > { %v3431_v30 = vpop.eup %3430 }
 0x47b   : > { %v1661_v36 = vsel %vm1283_vm13, %v3431_v30, 0.0 }
 0x47c   : > { %v4103_v39 = vpop.eup %3432  ;;  %1662 = vadd.xlane.f32.xlu0 %v1661_v36 }
 0x47d   : > { %v1664_v28 = vsel %vm1283_vm13, %v4103_v39, 0.0 }
 0x47e   : > { %1665 = vadd.xlane.f32.xlu1 %v1664_v28 }
 0x489   : > { %v1568_v29 = vpop.permute.xlu1 %1567 }
 0x48a   : > { %1588 = vmatpush.bf16.msra.mxu3 %v1568_v29 }
 0x48b   : > { %v1426_v31 = vpop.xlane.xlu0 %1425 }
 0x48c   : > { %3434 = vrcp.f32 %v1426_v31 }
 0x490   : > { %1686 = vrot.lane.b32.xlu0 %v3948_v14, %s3575_s6  ;;  %v1539_v14 = vmul.f32 1.442695, %v1534_v45 }
 0x492   : > { %v3435_v43 = vpop.eup %3434 }
 0x493   : > { %v1436_v44 = vmul.f32 %v3435_v43, %v4060_v37 }
 0x495   : > { %v1439_v50 = vpack.c.bf16 %v1436_v44, %v1436_v44 }
 0x497   : > { %v1445_v54 = vunpack.c.l.b16 %v1439_v50 }
 0x499   : > { %v1543_v41 = vpop.xlane.xlu0 %1542 }
 0x4a1   : > { %v1429_v42 = vpop.xlane.xlu2 %1428  ;;  %v1432_v46 = vpop.xlane.xlu0 %1431 }
 0x4a2   : > { %3436 = vrcp.f32 %v1429_v42 }
 0x4a3   : > { %3438 = vrcp.f32 %v1543_v41 }
 0x4a8   : > { %v3437_v47 = vpop.eup %3436 }
 0x4a9   : > { %v1546_v40 = vpop.xlane.xlu2 %1545  ;;  %v3439_v48 = vpop.eup %3438  ;;  %v1437_v51 = vmul.f32 %v3437_v47, %v4076_v57 }
 0x4aa   : > { %3440 = vrcp.f32 %v1546_v40  ;;  %v1553_v53 = vmul.f32 %v3439_v48, %v4069_v49 }
 0x4ab   : > { %3442 = vrcp.f32 %v1432_v46  ;;  %v1440_v52 = vpack.c.bf16 %v1437_v51, %v1437_v51 }
 0x4ac   : > { %3444 = vpow2.f32 %v1539_v14  ;;  %v1556_v13 = vpack.c.bf16 %v1553_v53, %v1553_v53  ;;  %v3250_v14 = vld [vmem:[%s3779_s20 + $0x38] sm:$0xff]  ;;  %v3248_v53 = vld [vmem:[%s3779_s20 + $0x28] sm:$0xff] }
 0x4ad   : > { %v1446_v55 = vunpack.c.l.b16 %v1440_v52  ;;  %1833 = vmatpush.bf16.msra.mxu2 %v3250_v14  ;;  %v3249_v52 = vld [vmem:[%s3779_s20 + $0x30] sm:$0xff]  ;;  %v3266_v14 = vld [vmem:[%s3803_s3 + $0x74] sm:$0xf0] }
 0x4ae   : > { %v1562_v62 = vunpack.c.l.b16 %v1556_v13  ;;  %v1660_v6 = vpop.xlane.xlu0 %1659 }
 0x4af   : > { %v1448_v37 = vpack.c.b16 %v1446_v55, %v1445_v54  ;;  %v3247_v54 = vld [vmem:[%s3779_s20 + $0x20] sm:$0xff]  ;;  %v3246_v55 = vld [vmem:[%s3779_s20 + $0x18] sm:$0xff] }
 0x4b0   : > { %v3441_v58 = vpop.eup %3440 }
 0x4b1   : > { %v3443_v59 = vpop.eup %3442  ;;  %v1554_v60 = vmul.f32 %v3441_v58, %v4085_v4  ;;  %2990 = vmatmul.msk.bf16.vlgmr.msrb.gmra.mxu1 %vm1283_vm13, %v1448_v37  ;;  %v1685_v24 = vpop.permute.xlu2 %1684  ;;  %1834 = vmatpush.bf16.msra.mxu2 %v3249_v52  ;;  %v3245_v58 = vld [vmem:[%s3779_s20 + $0x10] sm:$0xff]  ;;  %v3244_v37 = vld [vmem:[%s3779_s20 + $0x8] sm:$0xff] }
 0x4b2   : > { %v1438_v57 = vmul.f32 %v3443_v59, %v4074_v56  ;;  %v3445_v0 = vpop.eup %3444  ;;  %v3265_v52 = vld [vmem:[%s3803_s3 + $0x74] sm:$0xf] }
 0x4b3   : > { %v1557_v61 = vpack.c.bf16 %v1554_v60, %v1554_v60  ;;  %v1547_v49 = vsel %vm1283_vm13, %v3445_v0, 0.0  ;;  %v3243_v60 = vld [vmem:[%s3779_s20] sm:$0xff]  ;;  %s4569_s20 = sld [smem:[#allocation28_spill]] (!%p3172_p1) }
 0x4b4   : > { %v1441_v2 = vpack.c.bf16 %v1438_v57, %v1438_v57 }
 0x4b5   : > { %v1563_v63 = vunpack.c.l.b16 %v1557_v61  ;;  %1835 = vmatpush.bf16.msra.mxu2 %v3248_v53 }
 0x4b6   : > { %v1447_v3 = vunpack.c.l.b16 %v1441_v2 }
 0x4b7   : > { %v1565_v1 = vpack.c.b16 %v1563_v63, %v1562_v62 }
 0x4b8   : > { %v1449_v5 = vpack.c.b16 %v1447_v3, %v1447_v3 }
 0x4b9   : > { %2994 = vmatmul.msk.bf16.vlgmr.msra.gmra.mxu3 %vm1283_vm13, %v1565_v1  ;;  %1836 = vmatpush.bf16.msra.mxu2 %v3247_v54  ;;  %v3098_v54 = vld [vmem:[%s3803_s3 + $0x78] sm:$0xf0] }
 0x4ba   : > { %1548 = vadd.xlane.f32.xlu0 %v1547_v49 }
 0x4bc   : > { %v4119_v4 = vpop.f32.mrf.mxu3 }
 0x4bd   : > { %1837 = vmatpush.bf16.msra.mxu2 %v3246_v55  ;;  %v3101_v55 = vor.u32 %v3265_v52, %v3098_v54 }
 0x4bf   : > { %2060 = vmatpush.bf16.msrb.mxu0 %v3101_v55 }
 0x4c1   : > { %2991 = vmatmul.msk.bf16.gmra.mxu1 %vm1283_vm13, %v1449_v5  ;;  %1838 = vmatpush.bf16.msra.mxu2 %v3245_v58  ;;  %v3088_v58 = vld [vmem:[%s3803_s3 + $0x60] sm:$0xf] }
 0x4c4   : > { %v4121_v8 = vpop.f32.mrf.mxu3 }
 0x4c5   : > { %1839 = vmatpush.bf16.msra.mxu2 %v3244_v37  ;;  %v3264_v37 = vld [vmem:[%s3803_s3 + $0x64] sm:$0xf0] }
 0x4c9   : > { %1840 = vmatpush.bf16.msra.mxu2 %v3243_v60  ;;  %v3090_v60 = vld [vmem:[%s3803_s3 + $0x68] sm:$0xf0] }
 0x4ef   : > { %v1663_v7 = vpop.xlane.xlu0 %1662 }
 0x4f0   : > { %3446 = vrcp.f32 %v1663_v7 }
 0x4f1   : > { %3448 = vrcp.f32 %v1660_v6  ;;  %v1666_v17 = vpop.xlane.xlu1 %1665 }
 0x4f2   : > { %3450 = vrcp.f32 %v1666_v17 }
 0x4f6   : > { %v3447_v56 = vpop.eup %3446 }
 0x4f7   : > { %v3449_v12 = vpop.eup %3448  ;;  %v1671_v10 = vmul.f32 %v3447_v56, %v3431_v30 }
 0x4f8   : > { %v1670_v15 = vmul.f32 %v3449_v12, %v4089_v9  ;;  %v3451_v27 = vpop.eup %3450 }
 0x4f9   : > { %v1674_v16 = vpack.c.bf16 %v1671_v10, %v1671_v10  ;;  %v1672_v38 = vmul.f32 %v3451_v27, %v4103_v39  ;;  %v3473_v27 = vld [vmem:[#allocation2] sm:$0xff] }
 0x4fa   : > { %v4123_v11 = vpop.f32.mrf.mxu3  ;;  %v1673_v20 = vpack.c.bf16 %v1670_v15, %v1670_v15 }
 0x4fb   : > { %v1680_v22 = vunpack.c.l.b16 %v1674_v16  ;;  %v1675_v9 = vpack.c.bf16 %v1672_v38, %v1672_v38 }
 0x4fc   : > { %v1679_v23 = vunpack.c.l.b16 %v1673_v20 }
 0x4fd   : > { %v1681_v32 = vunpack.c.l.b16 %v1675_v9 }
 0x4fe   : > { %v1682_v25 = vpack.c.b16 %v1680_v22, %v1679_v23  ;;  %v3472_v23 = vld [vmem:[#allocation2 + $0x10] sm:$0xff] }
 0x4ff   : > { %v1683_v33 = vpack.c.b16 %v1681_v32, %v1681_v32 }
 0x502   : > { %v1687_v18 = vpop.permute.xlu0 %1686  ;;  %v1363_v19 = vpop.f32.mrf.mxu3 }
 0x503   : > { %v1696_v21 = vsel %vm1343_vm11, %v1687_v18, 0 }
 0x504   : > { %1704 = vmatpush.bf16.msra.mxu1 %v1696_v21  ;;  %v3396_v21 = vld [vmem:[%s4560_s7] ss:$0 sm:$0xff] }
 0x508   : > { %1705 = vmatpush.bf16.msra.mxu1 %v1685_v24 }
 0x50b   : > { %2998 = vmatmul.msk.bf16.vlgmr.msra.gmra.mxu1 %vm1283_vm13, %v1682_v25 }
 0x51b   : > { %2999 = vmatmul.msk.bf16.gmra.mxu1 %vm1283_vm13, %v1683_v33  ;;  %v3474_v33 = vld [vmem:[#allocation2 + $0x8] sm:$0xff] }
 0x52d   : > { %v1549_v34 = vpop.xlane.xlu0 %1548 }
 0x52e   : > { %3452 = vrcp.f32 %v1549_v34  ;;  %v1473_v35 = vpop.f32.mrf.mxu1 }
 0x534   : > { %v3453_v30 = vpop.eup %3452 }
 0x535   : > { %v1555_v36 = vmul.f32 %v3453_v30, %v3445_v0 }
 0x536   : > { %v1475_v28 = vpop.f32.mrf.mxu1 }
 0x537   : > { %v1558_v29 = vpack.c.bf16 %v1555_v36, %v1555_v36  ;;  %v3379_v31 = vpack.i.bf16 %v1475_v28, %v1473_v35 }
 0x539   : > { %v1564_v41 = vunpack.c.l.b16 %v1558_v29  ;;  %3380 = vrot.lane.b32.xlu2 %v3379_v31, %s3576_s25 }
 0x53b   : > { %v1566_v42 = vpack.c.b16 %v1564_v41, %v1564_v41 }
 0x53c   : > { %v1590_v43 = vpop.f32.mrf.mxu3 }
 0x53d   : > { %2995 = vmatmul.msk.bf16.gmra.mxu3 %vm1283_vm13, %v1566_v42 }
 0x53e   : > { %v1478_v39 = vpop.f32.mrf.mxu1 }
 0x544   : > { %v1592_v44 = vpop.f32.mrf.mxu3 }
 0x545   : > { %v3384_v45 = vpack.i.bf16 %v1592_v44, %v1590_v43 }
 0x546   : > { %v1480_v46 = vpop.f32.mrf.mxu1 }
 0x547   : > { %3385 = vrot.lane.b32.xlu2 %v3384_v45, %s3577_s1 }
 0x588   : > { %v1707_v47 = vpop.f32.mrf.mxu1 }
 0x590   : > { %v1709_v40 = vpop.f32.mrf.mxu1 }
 0x591   : > { %v3389_v48 = vpack.i.bf16 %v1709_v40, %v1707_v47 }
 0x593   : > { %3390 = vrot.lane.b32.xlu2 %v3389_v48, %s3578_s18  ;;  %v3381_v61 = vpop.permute.xlu2 %3380 }
 0x594   : > { %v3383_v62 = vunpack.i.h.bf16 %v3381_v61  ;;  %v3382_v63 = vunpack.i.l.bf16 %v3381_v61 }
 0x596   : > { %v1753_v49 = vsel %vm1249_vm10, %v4121_v8, %v3383_v62  ;;  %v1752_v3 = vsel %vm1249_vm10, %v4119_v4, %v3382_v63  ;;  %v3262_v62 = vld [vmem:[%s3803_s3 + $0x54] sm:$0xf0]  ;;  %v3261_v63 = vld [vmem:[%s3803_s3 + $0x54] sm:$0xf] }
 0x598   : > { %v1712_v50 = vpop.f32.mrf.mxu1 }
 0x59b   : > { %1723 = vrot.lane.b32.xlu2 %v1478_v39, %s3576_s25  ;;  %s4568_s25 = sld [smem:[#allocation26_spill]] (!%p3172_p1) }
 0x5a0   : > { %v1714_v51 = vpop.f32.mrf.mxu1 }
 0x5a1   : > { %v3386_v57 = vpop.permute.xlu2 %3385  ;;  %v3096_v51 = vld [vmem:[%s3803_s3 + $0x70] sm:$0xf] }
 0x5a2   : > { %v3388_v0 = vunpack.i.h.bf16 %v3386_v57  ;;  %v3387_v1 = vunpack.i.l.bf16 %v3386_v57  ;;  %v3097_v53 = vor.u32 %v3266_v14, %v3096_v51  ;;  %v3080_v57 = vld [vmem:[%s3803_s3 + $0x50] sm:$0xf] }
 0x5a3   : > { %1747 = vrot.lane.b32.xlu2 %v1712_v50, %s3578_s18 }
 0x5a4   : > { %v1756_v7 = vsel %vm1755_vm14, %v1752_v3, %v3387_v1  ;;  %v1757_v56 = vsel %vm1755_vm14, %v1753_v49, %v3388_v0  ;;  %2042 = vmatpush.bf16.msrb.mxu3 %v3097_v53  ;;  %v3081_v0 = vor.u32 %v3262_v62, %v3080_v57  ;;  %v3082_v1 = vld [vmem:[%s3803_s3 + $0x58] sm:$0xf0]  ;;  %v3072_v49 = vld [vmem:[%s3803_s3 + $0x40] sm:$0xf]  ;;  %v3260_v3 = vld [vmem:[%s3803_s3 + $0x44] sm:$0xf0] }
 0x5c0   : > { %v1595_v59 = vpop.f32.mrf.mxu3 }
 0x5c1   : > { %1735 = vrot.lane.b32.xlu0 %v1595_v59, %s3577_s1  ;;  %v3263_v59 = vld [vmem:[%s3803_s3 + $0x64] sm:$0xf] }
 0x5c2   : > { %v3093_v61 = vor.u32 %v3263_v59, %v3090_v60  ;;  %v3397_v60 = vld [vmem:[%s4561_s15] ss:$0 sm:$0xff] }
 0x5c4   : > { %2061 = vmatpush.bf16.msrb.mxu0 %v3093_v61 }
 0x5c8   : > { %v1597_v13 = vpop.f32.mrf.mxu3 }
 0x5c9   : > { %v3089_v13 = vor.u32 %v3264_v37, %v3088_v58 }
 0x5cb   : > { %2043 = vmatpush.bf16.msrb.mxu3 %v3089_v13 }
 0x5cf   : > { %2044 = vmatpush.bf16.msrb.mxu3 %v3081_v0  ;;  %v3398_v0 = vld [vmem:[%s4562_s24] ss:$0 sm:$0xff] }
 0x5ed   : > { %v3391_v2 = vpop.permute.xlu2 %3390 }
 0x5ee   : > { %v3393_v5 = vunpack.i.h.bf16 %v3391_v2  ;;  %v3392_v6 = vunpack.i.l.bf16 %v3391_v2  ;;  %v3085_v2 = vor.u32 %v3261_v63, %v3082_v1 }
 0x5f0   : > { %v1760_v12 = vsel %vm1759_vm15, %v1756_v7, %v3392_v6  ;;  %v1761_v10 = vsel %vm1759_vm15, %v1757_v56, %v3393_v5  ;;  %2062 = vmatpush.bf16.msrb.mxu0 %v3085_v2  ;;  %v3259_v5 = vld [vmem:[%s3803_s3 + $0x44] sm:$0xf]  ;;  %v3073_v6 = vor.u32 %v3260_v3, %v3072_v49  ;;  %v3074_v7 = vld [vmem:[%s3803_s3 + $0x48] sm:$0xf0] }
 0x5f1   : > { %v3033_v15 = vpack.c.bf16 %v1761_v10, %v1760_v12  ;;  %v3077_v56 = vor.u32 %v3259_v5, %v3074_v7  ;;  %v3064_v12 = vld [vmem:[%s3803_s3 + $0x30] sm:$0xf]  ;;  %v3258_v10 = vld [vmem:[%s3803_s3 + $0x34] sm:$0xf0] }
 0x5f2   : > { %2045 = vmatpush.bf16.msrb.mxu3 %v3073_v6 }
 0x5f3   : > { %3034 = vmatmul.msk.bf16.vlgmr.msra.gmra.mxu2 %vm3032_vm2, %v3033_v15  ;;  %v3257_v15 = vld [vmem:[%s3803_s3 + $0x34] sm:$0xf] }
 0x5f4   : > { %2063 = vmatpush.bf16.msrb.mxu0 %v3077_v56 }
 0x5f5   : > { %v1724_v16 = vpop.permute.xlu2 %1723 }
 0x5f6   : > { %v1754_v8 = vsel %vm1249_vm10, %v4123_v11, %v1724_v16  ;;  %v3065_v16 = vor.u32 %v3258_v10, %v3064_v12 }
 0x5f8   : > { %2046 = vmatpush.bf16.msrb.mxu3 %v3065_v16 }
 0x5fd   : > { %v1748_v4 = vpop.permute.xlu2 %1747 }
 0x633   : > { %v1736_v17 = vpop.permute.xlu0 %1735 }
 0x634   : > { %v1758_v18 = vsel %vm1755_vm14, %v1754_v8, %v1736_v17  ;;  %v3066_v8 = vld [vmem:[%s3803_s3 + $0x38] sm:$0xf0] }
 0x635   : > { %v1762_v19 = vsel %vm1759_vm15, %v1758_v18, %v1748_v4  ;;  %v3069_v17 = vor.u32 %v3257_v15, %v3066_v8  ;;  %v3056_v4 = vld [vmem:[%s3803_s3 + $0x20] sm:$0xf]  ;;  %v3256_v18 = vld [vmem:[%s3803_s3 + $0x24] sm:$0xf0] }
 0x636   : > { %v3036_v20 = vpack.c.bf16 %v1762_v19, %v1762_v19  ;;  %v3255_v19 = vld [vmem:[%s3803_s3 + $0x24] sm:$0xf] }
 0x637   : > { %2064 = vmatpush.bf16.msrb.mxu0 %v3069_v17 }
 0x638   : > { %3037 = vmatmul.msk.bf16.gmra.mxu2 %vm3032_vm2, %v3036_v20  ;;  %v3057_v20 = vor.u32 %v3256_v18, %v3056_v4 }
 0x63a   : > { %2047 = vmatpush.bf16.msrb.mxu3 %v3057_v20 }
 0x676   : > { %v1842_v22 = vpop.f32.mrf.mxu2 }
 0x677   : > { %v1851_v24 = vadd.f32 %v3472_v23, %v1842_v22  ;;  %v3048_v23 = vld [vmem:[%s3803_s3 + $0x10] sm:$0xf] }
 0x679   : > { %v4156_v25 = vadd.f32 %v3396_v21, %v1851_v24  ;;  %v3254_v24 = vld [vmem:[%s3803_s3 + $0x14] sm:$0xf0] }
 0x67b   : > { %1863 = vadd.xlane.f32.xlu1 %v4156_v25 }
 0x67e   : > { %v1844_v11 = vpop.f32.mrf.mxu2 }
 0x67f   : > { %v1852_v38 = vadd.f32 %v3473_v27, %v1844_v11  ;;  %v3253_v11 = vld [vmem:[%s3803_s3 + $0x14] sm:$0xf]  ;;  %v3049_v27 = vor.u32 %v3254_v24, %v3048_v23 }
 0x681   : > { %v4159_v9 = vadd.f32 %v3396_v21, %v1852_v38  ;;  %v3050_v38 = vld [vmem:[%s3803_s3 + $0x18] sm:$0xf0]  ;;  %2048 = vmatpush.bf16.msrb.mxu3 %v3049_v27 }
 0x683   : > { %1865 = vadd.xlane.f32.xlu2 %v4159_v9 }
 0x6bb   : > { %v1847_v32 = vpop.f32.mrf.mxu2 }
 0x6bc   : > { %v1853_v34 = vadd.f32 %v3474_v33, %v1847_v32  ;;  %v3040_v32 = vld [vmem:[%s3803_s3] sm:$0xf]  ;;  %v3252_v33 = vld [vmem:[%s3803_s3 + $0x4] sm:$0xf0] }
 0x6be   : > { %v4162_v35 = vadd.f32 %v3396_v21, %v1853_v34  ;;  %v3058_v21 = vld [vmem:[%s3803_s3 + $0x28] sm:$0xf0] }
 0x6bf   : > { %v3061_v22 = vor.u32 %v3255_v19, %v3058_v21  ;;  %v1956_v19 = vld [vmem:[%s3808_s19] sm:$0x3] }
 0x6c0   : > { %1867 = vadd.xlane.f32.xlu0 %v4162_v35  ;;  %v4232_v20 = vperm.slane %v1956_v19, 1  ;;  %v4240_v24 = vperm.slane %v1956_v19, 0 }
 0x6c1   : > { %2065 = vmatpush.bf16.msrb.mxu0 %v3061_v22 }
 0x6c3   : > { %v1849_v30 = vpop.f32.mrf.mxu2 }
 0x6c4   : > { %v3053_v30 = vor.u32 %v3253_v11, %v3050_v38 }
 0x6c6   : > { %2066 = vmatpush.bf16.msrb.mxu0 %v3053_v30 }
 0x6ee   : > { %v1864_v36 = vpop.xlane.xlu1 %1863 }
 0x6ef   : > { %v1869_v28 = vmul.f32 0.015625, %v1864_v36  ;;  %v3251_v36 = vld [vmem:[%s3803_s3 + $0x4] sm:$0xf] }
 0x6f1   : > { %v1872_v29 = vsub.f32 %v4156_v25, %v1869_v28  ;;  %v3042_v28 = vld [vmem:[%s3803_s3 + $0x8] sm:$0xf0] }
 0x6f3   : > { %v4168_v31 = vsel %vm923_vm0, %v1872_v29, 0.0 }
 0x6f4   : > { %v1878_v41 = vmul.f32 %v4168_v31, %v4168_v31 }
 0x6f6   : > { %1881 = vadd.xlane.f32.xlu1 %v1878_v41  ;;  %v1866_v42 = vpop.xlane.xlu2 %1865  ;;  %v3041_v41 = vor.u32 %v3252_v33, %v3040_v32  ;;  %v3282_v32 = vld [vmem:[%s3813_s28 + $0x78] sm:$0xff] }
 0x6f7   : > { %v1870_v43 = vmul.f32 0.015625, %v1866_v42  ;;  %v3045_v42 = vor.u32 %v3251_v36, %v3042_v28  ;;  %2496 = vmatpush.bf16.msrb.mxu2 %v3282_v32 }
 0x6f8   : > { %2049 = vmatpush.bf16.msrb.mxu3 %v3041_v41  ;;  %v3281_v41 = vld [vmem:[%s3813_s28 + $0x70] sm:$0xff] }
 0x6f9   : > { %v1873_v39 = vsub.f32 %v4159_v9, %v1870_v43  ;;  %2067 = vmatpush.bf16.msrb.mxu0 %v3045_v42 }
 0x6fb   : > { %v4175_v44 = vsel %vm923_vm0, %v1873_v39, 0.0  ;;  %2497 = vmatpush.bf16.msrb.mxu2 %v3281_v41 }
 0x6fc   : > { %v1879_v45 = vmul.f32 %v4175_v44, %v4175_v44 }
 0x6fe   : > { %1883 = vadd.xlane.f32.xlu1 %v1879_v45 }
 0x733   : > { %v1868_v46 = vpop.xlane.xlu0 %1867 }
 0x734   : > { %v1871_v47 = vmul.f32 0.015625, %v1868_v46 }
 0x736   : > { %v1874_v40 = vsub.f32 %v4162_v35, %v1871_v47 }
 0x738   : > { %v4182_v48 = vsel %vm923_vm0, %v1874_v40, 0.0 }
 0x739   : > { %v1880_v50 = vmul.f32 %v4182_v48, %v4182_v48 }
 0x73b   : > { %1885 = vadd.xlane.f32.xlu1 %v1880_v50 }
 0x769   : > { %v1882_v34 = vpop.xlane.xlu1 %1881 }
 0x76a   : > { %v1887_v29 = vmul.f32 0.015625, %v1882_v34 }
 0x76c   : > { %v1890_v43 = vadd.f32 1e-05, %v1887_v29 }
 0x76e   : > { %3454 = vrsqrt.f32 %v1890_v43  ;;  %vm1899_vm4 = vweird.f32 %v1890_v43 }
 0x771   : > { %v1884_v39 = vpop.xlane.xlu1 %1883 }
 0x772   : > { %v1888_v45 = vmul.f32 0.015625, %v1884_v39 }
 0x774   : > { %v3455_v46 = vpop.eup %3454  ;;  %v1891_v47 = vadd.f32 1e-05, %v1888_v45 }
 0x775   : > { %v1894_v40 = vmul.f32 %v3455_v46, %v1890_v43  ;;  %vm1900_vm3 = vweird.f32 %v3455_v46 }
 0x776   : > { %3456 = vrsqrt.f32 %v1891_v47  ;;  %vm1901_vm5 = vmor %vm1899_vm4, %vm1900_vm3  ;;  %vm1909_vm7 = vweird.f32 %v1891_v47 }
 0x777   : > { %v1895_v50 = vmul.f32 %v3455_v46, %v1894_v40 }
 0x779   : > { %v1896_v51 = vmul.f32 0.5, %v1895_v50 }
 0x77b   : > { %v1897_v14 = vsub.f32 1.5, %v1896_v51 }
 0x77c   : > { %v3457_v52 = vpop.eup %3456 }
 0x77d   : > { %v1898_v53 = vmul.f32 %v3455_v46, %v1897_v14  ;;  %v1904_v54 = vmul.f32 %v3457_v52, %v1891_v47  ;;  %vm1910_vm6 = vweird.f32 %v3457_v52 }
 0x77e   : > { %vm1911_vm8 = vmor %vm1909_vm7, %vm1910_vm6 }
 0x77f   : > { %v1905_v55 = vmul.f32 %v3457_v52, %v1904_v54  ;;  %v1902_v58 = vsel %vm1901_vm5, %v3455_v46, %v1898_v53  ;;  %v3274_v46 = vld [vmem:[%s3813_s28 + $0x38] sm:$0xff] }
 0x780   : > { %v1923_v13 = vmul.f32 %v1902_v58, %v4168_v31  ;;  %2478 = vmatpush.bf16.msrb.mxu1 %v3274_v46  ;;  %v3270_v46 = vld [vmem:[%s3813_s28 + $0x18] sm:$0xff] }
 0x781   : > { %v1906_v37 = vmul.f32 0.5, %v1905_v55 }
 0x782   : > { %v1929_v63 = vmul.f32 %v3397_v60, %v1923_v13 }
 0x783   : > { %v1907_v59 = vsub.f32 1.5, %v1906_v37 }
 0x784   : > { %v1935_v2 = vadd.f32 %v3398_v0, %v1929_v63 }
 0x785   : > { %v1908_v61 = vmul.f32 %v3457_v52, %v1907_v59  ;;  %v3273_v59 = vld [vmem:[%s3813_s28 + $0x30] sm:$0xff] }
 0x786   : > { %2479 = vmatpush.bf16.msrb.mxu1 %v3273_v59 }
 0x787   : > { %v1912_v57 = vsel %vm1911_vm8, %v3457_v52, %v1908_v61  ;;  %v3280_v52 = vld [vmem:[%s3813_s28 + $0x68] sm:$0xff] }
 0x788   : > { %v1924_v62 = vmul.f32 %v1912_v57, %v4175_v44  ;;  %2498 = vmatpush.bf16.msrb.mxu2 %v3280_v52  ;;  %v3276_v52 = vld [vmem:[%s3813_s28 + $0x48] sm:$0xff] }
 0x78a   : > { %v1930_v1 = vmul.f32 %v3397_v60, %v1924_v62 }
 0x78c   : > { %v1936_v31 = vadd.f32 %v3398_v0, %v1930_v1 }
 0x78e   : > { %v1938_v49 = vpack.c.bf16 %v1936_v31, %v1935_v2  ;;  %v3279_v2 = vld [vmem:[%s3813_s28 + $0x60] sm:$0xff] }
 0x78f   : > { %2499 = vmatpush.bf16.msrb.mxu2 %v3279_v2  ;;  %v3275_v2 = vld [vmem:[%s3813_s28 + $0x40] sm:$0xff] }
 0x790   : > { %2050 = vmatmul.bf16.vlgmr.msrb.gmra.mxu3 %v1938_v49  ;;  %2068 = vmatmul.bf16.vlgmr.msrb.gmra.mxu0 %v1938_v49 }
 0x7ae   : > { %v1886_v3 = vpop.xlane.xlu1 %1885 }
 0x7af   : > { %v1889_v5 = vmul.f32 0.015625, %v1886_v3 }
 0x7b1   : > { %v1892_v6 = vadd.f32 1e-05, %v1889_v5 }
 0x7b3   : > { %3458 = vrsqrt.f32 %v1892_v6  ;;  %vm1919_vm10 = vweird.f32 %v1892_v6 }
 0x7b9   : > { %v3459_v7 = vpop.eup %3458 }
 0x7ba   : > { %v1914_v56 = vmul.f32 %v3459_v7, %v1892_v6  ;;  %vm1920_vm9 = vweird.f32 %v3459_v7  ;;  %v3272_v6 = vld [vmem:[%s3813_s28 + $0x28] sm:$0xff] }
 0x7bb   : > { %vm1921_vm11 = vmor %vm1919_vm10, %vm1920_vm9  ;;  %2480 = vmatpush.bf16.msrb.mxu1 %v3272_v6 }
 0x7bc   : > { %v1915_v44 = vmul.f32 %v3459_v7, %v1914_v56 }
 0x7be   : > { %v1916_v12 = vmul.f32 0.5, %v1915_v44 }
 0x7c0   : > { %v1917_v10 = vsub.f32 1.5, %v1916_v12 }
 0x7c2   : > { %v1918_v15 = vmul.f32 %v3459_v7, %v1917_v10 }
 0x7c4   : > { %v1922_v16 = vsel %vm1921_vm11, %v3459_v7, %v1918_v15 }
 0x7c5   : > { %v1925_v8 = vmul.f32 %v1922_v16, %v4182_v48 }
 0x7c7   : > { %v1931_v17 = vmul.f32 %v3397_v60, %v1925_v8  ;;  %v3278_v8 = vld [vmem:[%s3813_s28 + $0x58] sm:$0xff] }
 0x7c8   : > { %2500 = vmatpush.bf16.msrb.mxu2 %v3278_v8 }
 0x7c9   : > { %v1937_v4 = vadd.f32 %v3398_v0, %v1931_v17 }
 0x7cb   : > { %v1939_v18 = vpack.c.bf16 %v1937_v4, %v1937_v4 }
 0x7cd   : > { %2055 = vmatmul.bf16.gmra.mxu3 %v1939_v18  ;;  %2073 = vmatmul.bf16.gmra.mxu0 %v1939_v18 }
 0x80d   : > { %v2069_v21 = vpop.f32.mrf.mxu0 }
 0x80e   : > { %v4235_v22 = vadd.f32 %v2069_v21, %v4232_v20  ;;  %v3271_v21 = vld [vmem:[%s3813_s28 + $0x20] sm:$0xff] }
 0x80f   : > { %2481 = vmatpush.bf16.msrb.mxu1 %v3271_v21 }
 0x810   : > { %v4238_v23 = vmul.f32 0.70710677, %v4235_v22 }
 0x812   : > { %v2130_v48 = vmul.f32 %v4238_v23, %v4238_v23 }
 0x813   : > { %v2051_v11 = vpop.f32.mrf.mxu3  ;;  %2482 = vmatpush.bf16.msrb.mxu1 %v3270_v46 }
 0x814   : > { %v4244_v27 = vmin.f32 %v2130_v48, 16.0  ;;  %v4247_v38 = vadd.f32 %v2051_v11, %v4240_v24 }
 0x815   : > { %v2071_v33 = vpop.f32.mrf.mxu0 }
 0x816   : > { %v2132_v34 = vmul.f32 2.1237322e-06, %v4244_v27  ;;  %v2143_v30 = vmul.f32 3.8918573e-05, %v4244_v27  ;;  %v4253_v36 = vadd.f32 %v2071_v33, %v4232_v20  ;;  %v4256_v28 = vmul.f32 0.70710677, %v4247_v38 }
 0x818   : > { %v2144_v29 = vadd.f32 0.001143296, %v2143_v30  ;;  %v2133_v42 = vadd.f32 0.00028619796, %v2132_v34  ;;  %v2090_v43 = vmul.f32 %v4256_v28, %v4256_v28  ;;  %v4262_v39 = vmul.f32 0.70710677, %v4253_v36 }
 0x819   : > { %v3277_v30 = vld [vmem:[%s3813_s28 + $0x50] sm:$0xff] }
 0x81a   : > { %v2145_v45 = vmul.f32 %v2144_v29, %v4244_v27  ;;  %v4266_v47 = vmin.f32 %v2090_v43, 16.0  ;;  %v2210_v40 = vmul.f32 %v4262_v39, %v4262_v39  ;;  %v2134_v53 = vmul.f32 %v2133_v42, %v4244_v27  ;;  %2501 = vmatpush.bf16.msrb.mxu2 %v3277_v30 }
 0x81b   : > { %v2053_v50 = vpop.f32.mrf.mxu3 }
 0x81c   : > { %v2146_v51 = vadd.f32 0.014752088, %v2145_v45  ;;  %v4271_v14 = vadd.f32 %v2053_v50, %v4240_v24  ;;  %v2103_v54 = vmul.f32 3.8918573e-05, %v4266_v47  ;;  %v4276_v55 = vmin.f32 %v2210_v40, 16.0 }
 0x81d   : > { %v2092_v13 = vmul.f32 2.1237322e-06, %v4266_v47  ;;  %v2135_v0 = vadd.f32 0.0036580483, %v2134_v53 }
 0x81e   : > { %v2147_v58 = vmul.f32 %v2146_v51, %v4244_v27  ;;  %v4280_v37 = vmul.f32 0.70710677, %v4271_v14  ;;  %v2104_v60 = vadd.f32 0.001143296, %v2103_v54  ;;  %v2212_v61 = vmul.f32 2.1237322e-06, %v4276_v55  ;;  %2502 = vmatpush.bf16.msrb.mxu2 %v3276_v52 }
 0x81f   : > { %v2223_v62 = vmul.f32 3.8918573e-05, %v4276_v55  ;;  %v2093_v7 = vadd.f32 0.00028619796, %v2092_v13  ;;  %v2136_v17 = vmul.f32 %v2135_v0, %v4244_v27 }
 0x820   : > { %v2148_v57 = vadd.f32 0.112945676, %v2147_v58  ;;  %v2170_v63 = vmul.f32 %v4280_v37, %v4280_v37  ;;  %v2105_v1 = vmul.f32 %v2104_v60, %v4266_v47  ;;  %v2213_v49 = vadd.f32 0.00028619796, %v2212_v61  ;;  %v3269_v61 = vld [vmem:[%s3813_s28 + $0x10] sm:$0xff] }
 0x821   : > { %v2224_v3 = vadd.f32 0.001143296, %v2223_v62  ;;  %v2094_v48 = vmul.f32 %v2093_v7, %v4266_v47  ;;  %v2137_v42 = vadd.f32 0.05243302, %v2136_v17  ;;  %2483 = vmatpush.bf16.msrb.mxu1 %v3269_v61  ;;  %v3268_v7 = vld [vmem:[%s3813_s28 + $0x8] sm:$0xff] }
 0x822   : > { %v2149_v31 = vmul.f32 %v2148_v57, %v4244_v27  ;;  %v4291_v5 = vmin.f32 %v2170_v63, 16.0  ;;  %v2106_v56 = vadd.f32 0.014752088, %v2105_v1  ;;  %v2214_v18 = vmul.f32 %v2213_v49, %v4276_v55  ;;  %2503 = vmatpush.bf16.msrb.mxu2 %v3275_v2 }
 0x823   : > { %v2225_v12 = vmul.f32 %v2224_v3, %v4276_v55  ;;  %v2095_v40 = vadd.f32 0.0036580483, %v2094_v48  ;;  %v2138_v58 = vmul.f32 %v2137_v42, %v4244_v27 }
 0x824   : > { %v2150_v44 = vadd.f32 0.4994258, %v2149_v31  ;;  %v2107_v10 = vmul.f32 %v2106_v56, %v4266_v47  ;;  %v2172_v15 = vmul.f32 2.1237322e-06, %v4291_v5  ;;  %v2183_v16 = vmul.f32 3.8918573e-05, %v4291_v5 }
 0x825   : > { %v2226_v19 = vadd.f32 0.014752088, %v2225_v12  ;;  %v2215_v43 = vadd.f32 0.0036580483, %v2214_v18  ;;  %v2096_v57 = vmul.f32 %v2095_v40, %v4266_v47  ;;  %v2139_v3 = vadd.f32 0.18741608, %v2138_v58  ;;  %2484 = vmatpush.bf16.msrb.mxu1 %v3268_v7 }
 0x826   : > { %v2151_v4 = vmul.f32 %v2150_v44, %v4244_v27  ;;  %v2108_v11 = vadd.f32 0.112945676, %v2107_v10  ;;  %v2184_v32 = vadd.f32 0.001143296, %v2183_v16  ;;  %v2173_v41 = vadd.f32 0.00028619796, %v2172_v15 }
 0x827   : > { %v2227_v34 = vmul.f32 %v2226_v19, %v4276_v55  ;;  %v2216_v59 = vmul.f32 %v2215_v43, %v4276_v55  ;;  %v2097_v44 = vadd.f32 0.05243302, %v2096_v57  ;;  %v3267_v19 = vld [vmem:[%s3813_s28] sm:$0xff] }
 0x828   : > { %v4304_v33 = vadd.f32 1.0, %v2151_v4  ;;  %v2109_v29 = vmul.f32 %v2108_v11, %v4266_v47  ;;  %v2185_v45 = vmul.f32 %v2184_v32, %v4291_v5  ;;  %v2174_v54 = vmul.f32 %v2173_v41, %v4291_v5 }
 0x829   : > { %v2228_v51 = vadd.f32 0.112945676, %v2227_v34  ;;  %v2217_v6 = vadd.f32 0.05243302, %v2216_v59  ;;  %v2140_v4 = vmul.f32 %v2139_v3, %v4244_v27  ;;  %v2098_v11 = vmul.f32 %v2097_v44, %v4266_v47  ;;  %2485 = vmatpush.bf16.msrb.mxu1 %v3267_v19 }
 0x82a   : > { %3460 = vrcp.f32 %v4304_v33  ;;  %v2110_v50 = vadd.f32 0.4994258, %v2109_v29  ;;  %v2186_v60 = vadd.f32 0.014752088, %v2185_v45  ;;  %v2175_v49 = vadd.f32 0.0036580483, %v2174_v54 }
 0x82b   : > { %v2229_v13 = vmul.f32 %v2228_v51, %v4276_v55  ;;  %v2218_v18 = vmul.f32 %v2217_v6, %v4276_v55  ;;  %v2164_v32 = vand.u32 2147483648, %v4304_v33  ;;  %vm2158_vm13 = vweird.f32 %v4304_v33 }
 0x82c   : > { %v2111_v53 = vmul.f32 %v2110_v50, %v4266_v47  ;;  %v2187_v1 = vmul.f32 %v2186_v60, %v4291_v5  ;;  %v2176_v8 = vmul.f32 %v2175_v49, %v4291_v5  ;;  %v2162_v30 = vand.u32 2147483647, %v4304_v33 }
 0x82d   : > { %v2230_v0 = vadd.f32 0.4994258, %v2229_v13  ;;  %v2219_v42 = vadd.f32 0.18741608, %v2218_v18  ;;  %v2141_v43 = vadd.f32 1.1283791, %v2140_v4 }
 0x82e   : > { %v4320_v62 = vadd.f32 1.0, %v2111_v53  ;;  %v2188_v10 = vadd.f32 0.112945676, %v2187_v1  ;;  %v2177_v27 = vadd.f32 0.05243302, %v2176_v8  ;;  %v2165_v50 = vor.u32 1.1754944e-38, %v2164_v32 }
 0x82f   : > { %v2231_v12 = vmul.f32 %v2230_v0, %v4276_v55  ;;  %v2099_v46 = vadd.f32 0.18741608, %v2098_v11  ;;  %vm2163_vm15 = vcmp.eq.f32.partialorder %v2162_v30, 8.507059e+37  ;;  %v2142_v13 = vmul.f32 %v2141_v43, %v4238_v23 }
 0x830   : > { %v3461_v63 = vpop.eup %3460  ;;  %3462 = vrcp.f32 %v4320_v62  ;;  %v2189_v17 = vmul.f32 %v2188_v10, %v4291_v5  ;;  %v2178_v53 = vmul.f32 %v2177_v27, %v4291_v5  ;;  %vm2118_vm1 = vweird.f32 %v4320_v62 }
 0x831   : > { %v2154_v31 = vmul.f32 %v3461_v63, %v4304_v33  ;;  %v4328_v16 = vadd.f32 1.0, %v2231_v12  ;;  %vm2159_vm12 = vweird.f32 %v3461_v63  ;;  %v2220_v33 = vmul.f32 %v2219_v42, %v4276_v55 }
 0x832   : > { %v2190_v29 = vadd.f32 0.4994258, %v2189_v17  ;;  %vm2160_vm14 = vmor %vm2158_vm13, %vm2159_vm12  ;;  %v2100_v60 = vmul.f32 %v2099_v46, %v4266_v47  ;;  %v2122_v57 = vand.u32 2147483647, %v4320_v62  ;;  %v2124_v1 = vand.u32 2147483648, %v4320_v62 }
 0x833   : > { %v2155_v56 = vsub.f32 1.0, %v2154_v31  ;;  %3464 = vrcp.f32 %v4328_v16  ;;  %v2244_v55 = vand.u32 2147483648, %v4328_v16  ;;  %v2179_v2 = vadd.f32 0.18741608, %v2178_v53 }
 0x834   : > { %v2191_v40 = vmul.f32 %v2190_v29, %v4291_v5  ;;  %v2221_v31 = vadd.f32 1.1283791, %v2220_v33  ;;  %v2242_v23 = vand.u32 2147483647, %v4328_v16  ;;  %v2101_v47 = vadd.f32 1.1283791, %v2100_v60 }
 0x835   : > { %v2156_v15 = vmul.f32 %v3461_v63, %v2155_v56  ;;  %vm2123_vm5 = vcmp.eq.f32.partialorder %v2122_v57, 8.507059e+37  ;;  %vm2238_vm6 = vweird.f32 %v4328_v16  ;;  %v2125_v12 = vor.u32 1.1754944e-38, %v2124_v1 }
 0x836   : > { %v3463_v21 = vpop.eup %3462  ;;  %v4343_v54 = vadd.f32 1.0, %v2191_v40  ;;  %v2245_v10 = vor.u32 1.1754944e-38, %v2244_v55  ;;  %vm2243_vm8 = vcmp.eq.f32.partialorder %v2242_v23, 8.507059e+37  ;;  %v2102_v19 = vmul.f32 %v2101_v47, %v4256_v28 }
 0x837   : > { %v2157_v48 = vadd.f32 %v3461_v63, %v2156_v15  ;;  %v2114_v34 = vmul.f32 %v3463_v21, %v4320_v62  ;;  %vm2119_vm2 = vweird.f32 %v3463_v21  ;;  %v2180_v15 = vmul.f32 %v2179_v2, %v4291_v5 }
 0x838   : > { %3466 = vrcp.f32 %v4343_v54  ;;  %vm4357_vm4 = vmor %vm2118_vm1, %vm2119_vm2  ;;  %v2222_v62 = vmul.f32 %v2221_v31, %v4262_v39  ;;  %v2202_v32 = vand.u32 2147483647, %v4343_v54  ;;  %v2079_v29 = vmul.f32 0.5, %v4235_v22 }
 0x839   : > { %v2115_v41 = vsub.f32 1.0, %v2114_v34  ;;  %v2161_v45 = vsel %vm2160_vm14, %v3461_v63, %v2157_v48  ;;  %v3465_v52 = vpop.eup %3464  ;;  %v2181_v11 = vadd.f32 1.1283791, %v2180_v15  ;;  %v2204_v34 = vand.u32 2147483648, %v4343_v54 }
 0x83a   : > { %v2166_v58 = vsel %vm2163_vm15, %v2165_v50, %v2161_v45  ;;  %v2234_v59 = vmul.f32 %v3465_v52, %v4328_v16  ;;  %vm2239_vm3 = vweird.f32 %v3465_v52  ;;  %v2081_v28 = vmul.f32 0.5, %v4253_v36 }
 0x83b   : > { %v2116_v51 = vmul.f32 %v3463_v21, %v2115_v41  ;;  %v2167_v0 = vmul.f32 %v2166_v58, %v2142_v13  ;;  %vm2240_vm7 = vmor %vm2238_vm6, %vm2239_vm3  ;;  %vm2198_vm10 = vweird.f32 %v4343_v54  ;;  %v2182_v46 = vmul.f32 %v2181_v11, %v4280_v37 }
 0x83c   : > { %v2235_v63 = vsub.f32 1.0, %v2234_v59  ;;  %v2205_v40 = vor.u32 1.1754944e-38, %v2204_v34  ;;  %vm2203_vm12 = vcmp.eq.f32.partialorder %v2202_v32, 8.507059e+37 }
 0x83d   : > { %v2117_v61 = vadd.f32 %v3463_v21, %v2116_v51  ;;  %v3103_v44 = vclamps-f32 %v2167_v0, 1.0  ;;  %v2080_v0 = vmul.f32 0.5, %v4271_v14 }
 0x83e   : > { %v2236_v49 = vmul.f32 %v3465_v52, %v2235_v63  ;;  %v3467_v56 = vpop.eup %3466  ;;  %v2078_v63 = vmul.f32 0.5, %v4247_v38 }
 0x83f   : > { %v2121_v6 = vsel %vm4357_vm4, %v3463_v21, %v2117_v61  ;;  %v2194_v17 = vmul.f32 %v3467_v56, %v4343_v54  ;;  %v2331_v16 = vadd.f32 1.0, %v3103_v44  ;;  %vm2199_vm9 = vweird.f32 %v3467_v56 }
 0x840   : > { %v2237_v7 = vadd.f32 %v3465_v52, %v2236_v49  ;;  %v2126_v4 = vsel %vm2123_vm5, %v2125_v12, %v2121_v6  ;;  %vm2200_vm11 = vmor %vm2198_vm10, %vm2199_vm9 }
 0x841   : > { %v2195_v48 = vsub.f32 1.0, %v2194_v17  ;;  %v2127_v30 = vmul.f32 %v2126_v4, %v2102_v19  ;;  %v2337_v45 = vmul.f32 %v2331_v16, %v2079_v29 }
 0x842   : > { %v2241_v8 = vsel %vm2240_vm7, %v3465_v52, %v2237_v7 }
 0x843   : > { %v2246_v18 = vsel %vm2243_vm8, %v2245_v10, %v2241_v8  ;;  %v2196_v27 = vmul.f32 %v3467_v56, %v2195_v48  ;;  %v3102_v51 = vclamps-f32 %v2127_v30, 1.0 }
 0x844   : > { %v2247_v21 = vmul.f32 %v2246_v18, %v2222_v62 }
 0x845   : > { %v2197_v43 = vadd.f32 %v3467_v56, %v2196_v27  ;;  %v2330_v37 = vadd.f32 1.0, %v3102_v51 }
 0x846   : > { %v3105_v5 = vclamps-f32 %v2247_v21, 1.0 }
 0x847   : > { %v2201_v22 = vsel %vm2200_vm11, %v3467_v56, %v2197_v43 }
 0x848   : > { %v2333_v42 = vadd.f32 1.0, %v3105_v5 }
 0x84a   : > { %v2074_v39 = vpop.f32.mrf.mxu0  ;;  %v2339_v52 = vmul.f32 %v2333_v42, %v2081_v28 }
 0x84b   : > { %v4372_v41 = vadd.f32 %v2074_v39, %v4232_v20  ;;  %v2206_v20 = vsel %vm2203_vm12, %v2205_v40, %v2201_v22 }
 0x84c   : > { %v2343_v53 = vpack.c.bf16 %v2339_v52, %v2337_v45  ;;  %v2207_v58 = vmul.f32 %v2206_v20, %v2182_v46 }
 0x84d   : > { %v4378_v50 = vmul.f32 0.70710677, %v4372_v41 }
 0x84e   : > { %v3104_v13 = vclamps-f32 %v2207_v58, 1.0  ;;  %2504 = vmatmul.bf16.vlgmr.msrb.gmra.mxu2 %v2343_v53 }
 0x84f   : > { %v2290_v36 = vmul.f32 %v4378_v50, %v4378_v50 }
 0x850   : > { %v2056_v33 = vpop.f32.mrf.mxu3  ;;  %v2332_v1 = vadd.f32 1.0, %v3104_v13 }
 0x851   : > { %v2291_v54 = vmin.f32 %v2290_v36, 16.0  ;;  %v4383_v59 = vadd.f32 %v2056_v33, %v4240_v24  ;;  %v2336_v24 = vmul.f32 %v2330_v37, %v2078_v63 }
 0x852   : > { %v2076_v60 = vpop.f32.mrf.mxu0  ;;  %v2338_v49 = vmul.f32 %v2332_v1, %v2080_v0 }
 0x853   : > { %v2292_v61 = vmul.f32 2.1237322e-06, %v2291_v54  ;;  %v4386_v57 = vmul.f32 0.70710677, %v4383_v59  ;;  %v2303_v55 = vmul.f32 3.8918573e-05, %v2291_v54 }
 0x854   : > { %v2342_v6 = vpack.c.bf16 %v2338_v49, %v2336_v24 }
 0x855   : > { %v2293_v2 = vadd.f32 0.00028619796, %v2292_v61  ;;  %v2250_v31 = vmul.f32 %v4386_v57, %v4386_v57  ;;  %v2304_v23 = vadd.f32 0.001143296, %v2303_v55 }
 0x856   : > { %2486 = vmatmul.bf16.vlgmr.msrb.gmra.mxu1 %v2342_v6 }
 0x857   : > { %v2294_v47 = vmul.f32 %v2293_v2, %v2291_v54  ;;  %v2251_v3 = vmin.f32 %v2250_v31, 16.0  ;;  %v2305_v56 = vmul.f32 %v2304_v23, %v2291_v54 }
 0x858   : > { %v2058_v7 = vpop.f32.mrf.mxu3 }
 0x859   : > { %v2252_v44 = vmul.f32 2.1237322e-06, %v2251_v3  ;;  %v2263_v12 = vmul.f32 3.8918573e-05, %v2251_v3  ;;  %v2295_v10 = vadd.f32 0.0036580483, %v2294_v47 }
 0x85a   : > { %v2306_v38 = vadd.f32 0.014752088, %v2305_v56 }
 0x85b   : > { %v2253_v14 = vadd.f32 0.00028619796, %v2252_v44  ;;  %v2264_v15 = vadd.f32 0.001143296, %v2263_v12  ;;  %v2296_v4 = vmul.f32 %v2295_v10, %v2291_v54  ;;  %v2083_v44 = vmul.f32 0.5, %v4372_v41 }
 0x85c   : > { %v2307_v62 = vmul.f32 %v2306_v38, %v2291_v54 }
 0x85d   : > { %v2254_v8 = vmul.f32 %v2253_v14, %v2251_v3  ;;  %v2265_v17 = vmul.f32 %v2264_v15, %v2251_v3  ;;  %v2297_v11 = vadd.f32 0.05243302, %v2296_v4 }
 0x85e   : > { %v2308_v18 = vadd.f32 0.112945676, %v2307_v62 }
 0x85f   : > { %v2255_v19 = vadd.f32 0.0036580483, %v2254_v8  ;;  %v2266_v21 = vadd.f32 0.014752088, %v2265_v17  ;;  %v2298_v39 = vmul.f32 %v2297_v11, %v2291_v54  ;;  %v2082_v8 = vmul.f32 0.5, %v4383_v59 }
 0x860   : > { %v2309_v48 = vmul.f32 %v2308_v18, %v2291_v54 }
 0x861   : > { %v2267_v16 = vmul.f32 %v2266_v21, %v2251_v3  ;;  %v2256_v34 = vmul.f32 %v2255_v19, %v2251_v3  ;;  %v2299_v45 = vadd.f32 0.18741608, %v2298_v39 }
 0x862   : > { %v2310_v32 = vadd.f32 0.4994258, %v2309_v48 }
 0x863   : > { %v2268_v30 = vadd.f32 0.112945676, %v2267_v16  ;;  %v2257_v28 = vadd.f32 0.05243302, %v2256_v34  ;;  %v2300_v52 = vmul.f32 %v2299_v45, %v2291_v54 }
 0x864   : > { %v2311_v5 = vmul.f32 %v2310_v32, %v2291_v54 }
 0x865   : > { %v2269_v27 = vmul.f32 %v2268_v30, %v2251_v3  ;;  %v2258_v46 = vmul.f32 %v2257_v28, %v2251_v3  ;;  %v2301_v53 = vadd.f32 1.1283791, %v2300_v52 }
 0x866   : > { %v2312_v29 = vadd.f32 1.0, %v2311_v5 }
 0x867   : > { %v2270_v42 = vadd.f32 0.4994258, %v2269_v27  ;;  %v2259_v22 = vadd.f32 0.18741608, %v2258_v46  ;;  %v2302_v0 = vmul.f32 %v2301_v53, %v4378_v50 }
 0x868   : > { %3468 = vrcp.f32 %v2312_v29  ;;  %v2324_v58 = vand.u32 2147483648, %v2312_v29  ;;  %v2322_v60 = vand.u32 2147483647, %v2312_v29  ;;  %vm2318_vm14 = vweird.f32 %v2312_v29 }
 0x869   : > { %v2271_v43 = vmul.f32 %v2270_v42, %v2251_v3  ;;  %v2260_v37 = vmul.f32 %v2259_v22, %v2251_v3 }
 0x86a   : > { %v2325_v1 = vor.u32 1.1754944e-38, %v2324_v58  ;;  %vm2323_vm1 = vcmp.eq.f32.partialorder %v2322_v60, 8.507059e+37 }
 0x86b   : > { %v2272_v40 = vadd.f32 1.0, %v2271_v43  ;;  %v2261_v2 = vadd.f32 1.1283791, %v2260_v37 }
 0x86d   : > { %3470 = vrcp.f32 %v2272_v40  ;;  %v2284_v31 = vand.u32 2147483648, %v2272_v40  ;;  %v2282_v23 = vand.u32 2147483647, %v2272_v40  ;;  %vm2278_vm3 = vweird.f32 %v2272_v40 }
 0x86e   : > { %v3469_v51 = vpop.eup %3468  ;;  %v2262_v56 = vmul.f32 %v2261_v2, %v4386_v57  ;;  %v3399_v57 = vld [vmem:[%s809_s22] ss:$0 sm:$0xff]  ;;  %s4567_s22 = sld [smem:[#allocation25_spill]] (!%p3172_p1) }
 0x86f   : > { %v2314_v20 = vmul.f32 %v3469_v51, %v2312_v29  ;;  %vm2319_vm13 = vweird.f32 %v3469_v51  ;;  %v2285_v7 = vor.u32 1.1754944e-38, %v2284_v31  ;;  %vm2283_vm5 = vcmp.eq.f32.partialorder %v2282_v23, 8.507059e+37 }
 0x870   : > { %vm2320_vm15 = vmor %vm2318_vm14, %vm2319_vm13 }
 0x871   : > { %v2315_v36 = vsub.f32 1.0, %v2314_v20 }
 0x873   : > { %v3471_v33 = vpop.eup %3470  ;;  %v2316_v13 = vmul.f32 %v3469_v51, %v2315_v36 }
 0x874   : > { %v2274_v61 = vmul.f32 %v3471_v33, %v2272_v40  ;;  %vm2279_vm2 = vweird.f32 %v3471_v33 }
 0x875   : > { %v2317_v63 = vadd.f32 %v3469_v51, %v2316_v13  ;;  %vm2280_vm4 = vmor %vm2278_vm3, %vm2279_vm2 }
 0x876   : > { %v2275_v55 = vsub.f32 1.0, %v2274_v61 }
 0x877   : > { %v2321_v54 = vsel %vm2320_vm15, %v3469_v51, %v2317_v63 }
 0x878   : > { %v2326_v24 = vsel %vm2323_vm1, %v2325_v1, %v2321_v54  ;;  %v2276_v49 = vmul.f32 %v3471_v33, %v2275_v55 }
 0x879   : > { %v2327_v47 = vmul.f32 %v2326_v24, %v2302_v0 }
 0x87a   : > { %v2277_v3 = vadd.f32 %v3471_v33, %v2276_v49 }
 0x87b   : > { %v3107_v6 = vclamps-f32 %v2327_v47, 1.0 }
 0x87c   : > { %v2281_v50 = vsel %vm2280_vm4, %v3471_v33, %v2277_v3 }
 0x87d   : > { %v2335_v12 = vadd.f32 1.0, %v3107_v6  ;;  %v2286_v10 = vsel %vm2283_vm5, %v2285_v7, %v2281_v50 }
 0x87e   : > { %v2287_v38 = vmul.f32 %v2286_v10, %v2262_v56 }
 0x87f   : > { %v2341_v14 = vmul.f32 %v2335_v12, %v2083_v44 }
 0x880   : > { %v3106_v15 = vclamps-f32 %v2287_v38, 1.0 }
 0x881   : > { %v2345_v62 = vpack.c.bf16 %v2341_v14, %v2341_v14 }
 0x882   : > { %v2334_v17 = vadd.f32 1.0, %v3106_v15 }
 0x883   : > { %2509 = vmatmul.bf16.gmra.mxu2 %v2345_v62 }
 0x884   : > { %v2340_v4 = vmul.f32 %v2334_v17, %v2082_v8 }
 0x886   : > { %v2344_v18 = vpack.c.bf16 %v2340_v4, %v2340_v4 }
 0x888   : > { %2491 = vmatmul.bf16.gmra.mxu1 %v2344_v18 }
 0x8d1   : > { %v2505_v41 = vpop.f32.mrf.mxu2 }
 0x8d3   : > { %v2487_v19 = vpop.f32.mrf.mxu1 }
 0x8d4   : > { %v2488_v21 = vadd.f32 %v3399_v57, %v2487_v19 }
 0x8d6   : > { %v2506_v48 = vadd.f32 %v2505_v41, %v2488_v21 }
 0x8d8   : > { %v2514_v16 = vadd.f32 %v2506_v48, %v4156_v25 }
 0x8d9   : > { %v2507_v59 = vpop.f32.mrf.mxu2 }
 0x8da   : > { %2517 = vst [vmem:[#allocation2 + $0x10] sm:$0xff] %v2514_v16 }
 0x8db   : > { %v2489_v11 = vpop.f32.mrf.mxu1 }
 0x8dc   : > { %v2490_v32 = vadd.f32 %v3399_v57, %v2489_v11 }
 0x8de   : > { %v2508_v34 = vadd.f32 %v2507_v59, %v2490_v32 }
 0x8e0   : > { %v2515_v30 = vadd.f32 %v2508_v34, %v4159_v9 }
 0x8e2   : > { %2518 = vst [vmem:[#allocation2] sm:$0xff] %v2515_v30 }
 0x905   : > { %v2492_v5 = vpop.f32.mrf.mxu1 }
 0x906   : > { %v2493_v27 = vadd.f32 %v3399_v57, %v2492_v5  ;;  %v2510_v39 = vpop.f32.mrf.mxu2 }
 0x908   : > { %v2511_v29 = vadd.f32 %v2510_v39, %v2493_v27 }
 0x90a   : > { %v2516_v28 = vadd.f32 %v2511_v29, %v4162_v35  ;;  %2523 = sbr.rel (%p3172_p1) target bundleno = 2725 (0xaa5), region = 104 }
 0x90c   : > { %2519 = vst [vmem:[#allocation2 + $0x8] sm:$0xff] %v2516_v28 }
 0x90d   : > { %v2494_v42 = vpop.f32.mrf.mxu1 }
 0x90e   : > { %v2512_v43 = vpop.f32.mrf.mxu2 }
 0x90f   : > { %vm2526_vm6 = vcmask 1040384   ;;  %v3290_v9 = vld [vmem:[%s4566_s5 + $0x38] sm:$0xff]  ;;  %v3289_v22 = vld [vmem:[%s4566_s5 + $0x30] sm:$0xff]  ;;  %v3288_v20 = vld [vmem:[%s4566_s5 + $0x28] sm:$0xff] }
 0x910   : > { %v2527_v25 = vsel %vm2526_vm6, %v2514_v16, 0.0  ;;  %2618 = vmatpush.bf16.msra.mxu0 %v3290_v9  ;;  %v3287_v36 = vld [vmem:[%s4566_s5 + $0x20] sm:$0xff]  ;;  %v3286_v26 = vld [vmem:[%s4566_s5 + $0x18] sm:$0xff]  ;;  %v3285_v53 = vld [vmem:[%s4566_s5 + $0x10] sm:$0xff] }
 0x911   : > { %2528 = vadd.xlane.f32.xlu0 %v2527_v25  ;;  %v3284_v58 = vld [vmem:[%s4566_s5 + $0x8] sm:$0xff]  ;;  %v3283_v33 = vld [vmem:[%s4566_s5] sm:$0xff] }
 0x912   : > { %v2524_v54 = vld [vmem:[%s4567_s22] sm:$0x1] }
 0x913   : > { %v2525_v49 = vld [vmem:[%s4568_s25] sm:$0x1] }
 0x914   : > { %2619 = vmatpush.bf16.msra.mxu0 %v3289_v22  ;;  %v2569_v6 = vld [vmem:[%s4569_s20] sm:$0x1] }
 0x918   : > { %2620 = vmatpush.bf16.msra.mxu0 %v3288_v20 }
 0x91c   : > { %2621 = vmatpush.bf16.msra.mxu0 %v3287_v36 }
 0x920   : > { %2622 = vmatpush.bf16.msra.mxu0 %v3286_v26 }
 0x924   : > { %2623 = vmatpush.bf16.msra.mxu0 %v3285_v53 }
 0x928   : > { %2624 = vmatpush.bf16.msra.mxu0 %v3284_v58 }
 0x92c   : > { %2625 = vmatpush.bf16.msra.mxu0 %v3283_v33 }
 0x984   : > { %v2529_v45 = vpop.xlane.xlu0 %2528 }
 0x985   : > { %v2530_v46 = vmul.f32 0.015625, %v2529_v45 }
 0x987   : > { %v2531_v40 = vsub.f32 %v2514_v16, %v2530_v46 }
 0x989   : > { %v2532_v35 = vsel %vm923_vm0, %v2531_v40, 0.0 }
 0x98a   : > { %v2533_v51 = vmul.f32 %v2532_v35, %v2532_v35 }
 0x98c   : > { %v2534_v52 = vsel %vm2526_vm6, %v2533_v51, 0.0 }
 0x98d   : > { %2535 = vadd.xlane.f32.xlu0 %v2534_v52 }
 0xa00   : > { %v2536_v37 = vpop.xlane.xlu0 %2535 }
 0xa01   : > { %v2537_v13 = vmul.f32 0.015625, %v2536_v37 }
 0xa03   : > { %v2538_v60 = vadd.f32 1e-05, %v2537_v13 }
 0xa05   : > { %3475 = vrsqrt.f32 %v2538_v60  ;;  %vm2545_vm7 = vweird.f32 %v2538_v60 }
 0xa0b   : > { %v3476_v61 = vpop.eup %3475 }
 0xa0c   : > { %v2540_v63 = vmul.f32 %v3476_v61, %v2538_v60  ;;  %vm2546_vm0 = vweird.f32 %v3476_v61 }
 0xa0d   : > { %vm2547_vm8 = vmor %vm2545_vm7, %vm2546_vm0 }
 0xa0e   : > { %v2541_v0 = vmul.f32 %v3476_v61, %v2540_v63 }
 0xa10   : > { %v2542_v1 = vmul.f32 0.5, %v2541_v0 }
 0xa12   : > { %v2543_v55 = vsub.f32 1.5, %v2542_v1 }
 0xa14   : > { %v2544_v2 = vmul.f32 %v3476_v61, %v2543_v55 }
 0xa16   : > { %v2548_v31 = vsel %vm2547_vm8, %v3476_v61, %v2544_v2 }
 0xa17   : > { %v2549_v24 = vmul.f32 %v2548_v31, %v2532_v35 }
 0xa19   : > { %v2550_v23 = vmul.f32 %v2549_v24, %v2524_v54 }
 0xa1b   : > { %v2551_v47 = vadd.f32 %v2550_v23, %v2525_v49 }
 0xa1d   : > { %v2552_v3 = vpack.c.bf16 %v2551_v47, %v2551_v47 }
 0xa1f   : > { %2626 = vmatmul.bf16.vlgmr.msra.gmra.mxu0 %v2552_v3 }
 0xa9c   : > { %v2627_v7 = vpop.f32.mrf.mxu0 }
 0xa9d   : > { %v2628_v56 = vadd.f32 %v2627_v7, %v2569_v6 }
 0xa9f   : > { %2631 = vst [vmem:[%s3821_s17] sm:$0x1] %v2628_v56 }
 0xaa4   : > { %v2629_v50 = vpop.f32.mrf.mxu0 }
 0xaa5 PF: > { %s4570_s21 = sld [smem:[#allocation9_spill]]  ;;  %s2643_s2 = sshll.u32 %s3821_s17, 4  ;;  %s2644_s2 = int_to_ptr.vmem [resolvable:$true] %s2643_s2 }
 0xaa6   : > { %s4571_s26 = sld [smem:[#allocation29_spill]]  ;;  %s4573_s19 = sand.u32 1, %s3547_s30  }
 0xaa7   : > { %s2633_s28 = scalar_lea.sflag [#allocation4], %s4573_s19 }
 0xaac   : > { %s2641_s29 = scalar_lea.hbm %s4571_s26, %s4570_s21  ;;  %s3497_s25 = scalar_lea.hbm %s4571_s26, 2 }
 0xaad   : > { %s2645_s24 = sshll.u32 %s2641_s29, 4  ;;  %s2646_s24 = int_to_ptr.hbm [resolvable:$true] %s2645_s24 }
 0xaae   : > { %s3491_s0 = sshra.s32 %s2646_s24, 4  ;;  %s3492_s0 = int_to_ptr.hbm [resolvable:$true] %s3491_s0 }
 0xaaf   : > { %s3493_s22 = scalar_lea.hbm %s3492_s0, 1  ;;  %p3498_p6 = scmp.lt.s32.totalorder %s3492_s0, %s4571_s26 }
 0xab0   : > { %p3494_p2 = scmp.ne.s32.totalorder %s3492_s0, %s3493_s22  ;;  %p3499_p7 = scmp.lt.s32.totalorder %s3497_s25, %s3493_s22 }
 0xab2   : > { %p3495_p4 = pnand %p3494_p2, %p3728_p3  ;;  %p3500_p8 = por %p3499_p7, %p3498_p6 }
 0xab4   : > { %p3496_p5 = pneg %p3495_p4 }
 0xab6   : > { %p3501_p10 = pnand %p3500_p8, %p3496_p5 }
 0xab8   : > { %3504 = shalt.err (!%p3501_p10)
}
 0xab9   : > { %3302 = dma.vmem_to_hbm [thread:$0]  (%p3728_p3), %s2644_s2, 16, %s2646_s24, %s2633_s28  }
 0xaba PF: > { %s4574_s17 = sld [smem:[#allocation12_spill]] }
 0xabb   : > { %s4575_s20 = sld [smem:[#allocation6_spill]] }
 0xac0   : > { %p3308_p11 = scmp.ge.s32.totalorder %s4574_s17, 2 }
 0xac1   : > { %s2657_s7 = sand.u32 1, %s4575_s20  }
 0xac2   : > { %p3305_p12 = pnand %p3308_p11, %p3738_p9  ;;  %s2658_s3 = scalar_lea.sflag [#allocation4], %s2657_s7 }
 0xac4   : > { %p3306_p13 = pneg %p3305_p12 }
 0xac6   : > { %3538 = dma.done.wait (%p3306_p13), %s2658_s3, 16  }
 0xac7   : > { %3540 = vsyncadd (%p3306_p13), %s2658_s3, 4294967280  ;;  %s32_s23 = sadd.s32 1, %s4574_s17   ;;  %s4577_s29 = sld [smem:[#allocation7_spill]] }
 0xac8   : > { %p29_p0 = scmp.ge.s32.totalorder %s32_s23, 6   ;;  %s4578_s20 = sld [smem:[#allocation17_spill]] }
 0xac9   : > { %s4579_s21 = sld [smem:[#allocation10_spill]]  ;;  %s4583_s0 = smov %s3547_s30 }
 0xaca   : > { %s4580_s1 = sld [smem:[#allocation11_spill]]  ;;  %31 = sbr.rel (!%p29_p0) target bundleno = 18 (0x12), region = 175 }
 0xacb   : > { %s4581_s22 = sld [smem:[#allocation13_spill]] }
 0xacc   : > { %s4582_s2 = sld [smem:[#allocation15_spill]] }
 0xacd   : > { %s4584_s30 = smov %s4577_s29 }
 0xacf   :  { %2663 = vsyncpa [#allocation4], 1 }
 0xad0   :  { %2665 = vsyncpa [#allocation4 + $0x1], 1 }

</bundles_post_ra>
